<compile_context>
chip_gen: v7x
topology: tpu7x:2x2x1
jax: 0.10.0
libtpu: 0.0.40
codegen_flags: <defaults>
</compile_context>

<pallas_src>
import math

import jax
import jax.numpy as jnp
from jax import lax
from jax.experimental import pallas as pl
from jax.experimental.pallas import tpu as pltpu


# ------------------------------ parameter init ------------------------------

def _bn_fold(weight, bias, running_mean, running_var, eps=1e-5):
    scale = weight / jnp.sqrt(running_var + eps)
    shift = bias - running_mean * scale
    return scale, shift


def init_params(key, cin, pe_dim, num_layers, nclass, heads=4):
    C = cin + pe_dim
    dh = C // heads
    keys = iter(jax.random.split(key, 1024))
    bf16 = jnp.bfloat16

    def nrm(shape, s=0.1):
        return jax.random.normal(next(keys), shape, jnp.float32) * s

    def bn(dim):
        # eval-mode BatchNorm1d with default running stats (mean=0, var=1)
        w = 1.0 + nrm((dim,), 0.05)
        b = nrm((dim,), 0.05)
        return _bn_fold(w, b, jnp.zeros((dim,), jnp.float32),
                        jnp.ones((dim,), jnp.float32))

    p = {}
    pes, peb = bn(20)
    p['pe_aff'] = jnp.stack([pes, peb], axis=0)                 # [2, 20]
    p['pe_w'] = nrm((20, pe_dim)).astype(bf16)
    p['pe_b'] = nrm((1, pe_dim))
    p['edge_emb'] = nrm((4, C), 1.0)                            # Embedding(4, C)

    scale = 1.0 / math.sqrt(dh)
    gw, gb, qw, qb, wo, bo = [], [], [], [], [], []
    m1w, m1b, m2w, m2b, bns = [], [], [], [], []
    for _ in range(num_layers):
        # GINEConv nn = Linear(C,C), ReLU, Linear(C,C)
        gw.append(jnp.stack([nrm((C, C)), nrm((C, C))]))        # [2, C, C]
        gb.append(jnp.stack([nrm((C,)), nrm((C,))]))            # [2, C]
        # MHA: per-head weight slabs [H, C, dh]; 1/sqrt(dh) folded into Q
        wq = nrm((heads, C, dh)) * scale
        bq = nrm((heads, dh)) * scale
        wk = nrm((heads, C, dh)); bk = nrm((heads, dh))
        wv = nrm((heads, C, dh)); bv = nrm((heads, dh))
        qw.append(jnp.concatenate([wq, wk, wv], axis=0))        # [3H, C, dh]
        qb.append(jnp.concatenate([bq, bk, bv], axis=0))        # [3H, dh]
        wo.append(nrm((C, C)))
        bo.append(nrm((1, C)))
        # GPSConv mlp = Linear(C,2C), ReLU, Linear(2C,C)
        m1w.append(nrm((C, 2 * C))); m1b.append(nrm((1, 2 * C)))
        m2w.append(nrm((2 * C, C))); m2b.append(nrm((1, C)))
        s1, b1 = bn(C); s2, b2 = bn(C); s3, b3 = bn(C)
        bns.append(jnp.stack([s1, b1, s2, b2, s3, b3]))         # [6, C]

    p['gine_w'] = jnp.stack(gw).astype(bf16)                    # [L, 2, C, C]
    p['gine_b'] = jnp.stack(gb)                                 # [L, 2, C]
    p['qkv_w'] = jnp.stack(qw).astype(bf16)                     # [L, 3H, C, dh]
    p['qkv_b'] = jnp.stack(qb)                                  # [L, 3H, dh]
    p['wo'] = jnp.stack(wo).astype(bf16)                        # [L, C, C]
    p['bo'] = jnp.stack(bo)                                     # [L, 1, C]
    p['mlp_w1'] = jnp.stack(m1w).astype(bf16)                   # [L, C, 2C]
    p['mlp_b1'] = jnp.stack(m1b)                                # [L, 1, 2C]
    p['mlp_w2'] = jnp.stack(m2w).astype(bf16)                   # [L, 2C, C]
    p['mlp_b2'] = jnp.stack(m2b)                                # [L, 1, C]
    p['bn'] = jnp.stack(bns)                                    # [L, 6, C]

    # head MLP: C -> C/2 -> C/4 -> nclass (tiny, f32)
    p['head_w1'] = nrm((C, C // 2)); p['head_b1'] = nrm((1, C // 2))
    p['head_w2'] = nrm((C // 2, C // 4)); p['head_b2'] = nrm((1, C // 4))
    p['head_w3'] = nrm((C // 4, nclass)); p['head_b3'] = nrm((1, nclass))
    p['heads'] = heads
    return p


# --------------------------- fused forward kernel ---------------------------

def gps_forward(params, x, pe, edge_index):
    """x: [1, N, Cin] f32, pe: [N, 20] f32, edge_index: [2, E] int32."""
    x0 = x[0]                                                   # torch x.squeeze(0)
    N, cin = x0.shape
    pe_dim = params['pe_w'].shape[1]
    C = cin + pe_dim
    H = params['heads']
    dh = C // H
    L = params['gine_w'].shape[0]
    nclass = params['head_w3'].shape[1]

    # dense adjacency with multiplicity: A[dst, src] += 1 (data-dependent
    # scatter; kept as XLA glue).  bf16 halves the HBM/VMEM footprint; the
    # single copy is reused by every layer inside the fused kernel.
    src, dst = edge_index[0], edge_index[1]
    A = jnp.zeros((N, N), jnp.float32).at[dst, src].add(1.0).astype(jnp.bfloat16)

    # edge_attr = ones -> every edge uses embedding row 1
    e = params['edge_emb'][1:2]                                 # [1, C]

    def kernel(x0_ref, pe_ref, a_ref, pe_aff_ref, pe_w_ref, pe_b_ref, e_ref,
               gw_ref, gb_ref, qw_ref, qb_ref, wo_ref, bo_ref,
               m1w_ref, m1b_ref, m2w_ref, m2b_ref, bn_ref,
               hw1_ref, hb1_ref, hw2_ref, hb2_ref, hw3_ref, hb3_ref,
               o_ref, h_scr, att_scr):
        l = pl.program_id(0)

        # ---- grid step 0: PE BatchNorm + Linear + concat -> initial features
        @pl.when(l == 0)
        def _():
            pe_n = pe_ref[...] * pe_aff_ref[0:1, :] + pe_aff_ref[1:2, :]
            x_pe = jnp.dot(pe_n.astype(jnp.bfloat16), pe_w_ref[...],
                           preferred_element_type=jnp.float32) + pe_b_ref[...]
            h_scr[:, 0:cin] = x0_ref[...]
            h_scr[:, cin:C] = x_pe

        x_cur = h_scr[...]                                      # [N, C] f32 carry
        xb = x_cur.astype(jnp.bfloat16)
        bn = bn_ref[...]                                        # [6, C]

        # ---- local MPNN: GINEConv (eps=0) -> +x -> BN1
        msg = jnp.maximum(x_cur + e_ref[...], 0.0).astype(jnp.bfloat16)
        aggr = jnp.dot(a_ref[...], msg, preferred_element_type=jnp.float32)
        g = jnp.dot((x_cur + aggr).astype(jnp.bfloat16), gw_ref[0],
                    preferred_element_type=jnp.float32) + gb_ref[0:1, :]
        g = jnp.maximum(g, 0.0).astype(jnp.bfloat16)
        g = jnp.dot(g, gw_ref[1],
                    preferred_element_type=jnp.float32) + gb_ref[1:2, :]
        h1 = (g + x_cur) * bn[0:1, :] + bn[1:2, :]

        # ---- global MHA: scale folded into Q weights; per-head weight slabs
        # indexed on a leading axis (no lane slicing of activations); bf16 MXU
        # operands; single K=C output projection after the head loop.
        for h in range(H):
            qh = (jnp.dot(xb, qw_ref[h], preferred_element_type=jnp.float32)
                  + qb_ref[h:h + 1, :]).astype(jnp.bfloat16)
            kh = (jnp.dot(xb, qw_ref[H + h], preferred_element_type=jnp.float32)
                  + qb_ref[H + h:H + h + 1, :]).astype(jnp.bfloat16)
            vh = (jnp.dot(xb, qw_ref[2 * H + h], preferred_element_type=jnp.float32)
                  + qb_ref[2 * H + h:2 * H + h + 1, :]).astype(jnp.bfloat16)
            # q @ k^T as an "nt" dot_general (no explicit transpose relayout)
            s = lax.dot_general(qh, kh, (((1,), (1,)), ((), ())),
                                preferred_element_type=jnp.float32)
            s = s - jnp.max(s, axis=-1, keepdims=True)
            p = jnp.exp(s)
            p = p * pl.reciprocal(jnp.sum(p, axis=-1, keepdims=True), approx=True)
            oh = jnp.dot(p.astype(jnp.bfloat16), vh,
                         preferred_element_type=jnp.float32)
            att_scr[:, h * dh:(h + 1) * dh] = oh
        attn = jnp.dot(att_scr[...].astype(jnp.bfloat16), wo_ref[...],
                       preferred_element_type=jnp.float32) + bo_ref[...]
        h2 = (attn + x_cur) * bn[2:3, :] + bn[3:4, :]

        # ---- combine + FFN + BN3 (all residuals fused in-kernel)
        out = h1 + h2
        m = jnp.dot(out.astype(jnp.bfloat16), m1w_ref[...],
                    preferred_element_type=jnp.float32) + m1b_ref[...]
        m = jnp.maximum(m, 0.0).astype(jnp.bfloat16)
        m = jnp.dot(m, m2w_ref[...],
                    preferred_element_type=jnp.float32) + m2b_ref[...]
        h_new = (m + out) * bn[4:5, :] + bn[5:6, :]
        h_scr[...] = h_new                                      # carry to next layer

        # ---- last grid step: head MLP + log_softmax
        @pl.when(l == pl.num_programs(0) - 1)
        def _():
            z = jnp.dot(h_new, hw1_ref[...],
                        preferred_element_type=jnp.float32) + hb1_ref[...]
            z = jnp.maximum(z, 0.0)
            z = jnp.dot(z, hw2_ref[...],
                        preferred_element_type=jnp.float32) + hb2_ref[...]
            z = jnp.maximum(z, 0.0)
            z = jnp.dot(z, hw3_ref[...],
                        preferred_element_type=jnp.float32) + hb3_ref[...]
            z = z - jnp.max(z, axis=-1, keepdims=True)
            o_ref[...] = z - jnp.log(jnp.sum(jnp.exp(z), axis=-1, keepdims=True))

    def full(shape):
        # globals: same block every layer -> DMA'd once, VMEM-resident
        return pl.BlockSpec(shape, lambda l, _n=len(shape): (0,) * _n)

    def per_layer(tail):
        # per-layer stacked weights: leading L axis squeezed out of the kernel ref
        return pl.BlockSpec((None,) + tail,
                            lambda l, _n=len(tail): (l,) + (0,) * _n)

    in_specs = [
        full((N, cin)), full((N, 20)), full((N, N)),
        full((2, 20)), full((20, pe_dim)), full((1, pe_dim)), full((1, C)),
        per_layer((2, C, C)), per_layer((2, C)),
        per_layer((3 * H, C, dh)), per_layer((3 * H, dh)),
        per_layer((C, C)), per_layer((1, C)),
        per_layer((C, 2 * C)), per_layer((1, 2 * C)),
        per_layer((2 * C, C)), per_layer((1, C)),
        per_layer((6, C)),
        full((C, C // 2)), full((1, C // 2)),
        full((C // 2, C // 4)), full((1, C // 4)),
        full((C // 4, nclass)), full((1, nclass)),
    ]

    grid_spec = pltpu.PrefetchScalarGridSpec(
        num_scalar_prefetch=0,
        grid=(L,),
        in_specs=in_specs,
        out_specs=pl.BlockSpec((N, nclass), lambda l: (0, 0)),
        scratch_shapes=[pltpu.VMEM((N, C), jnp.float32),    # node-feature carry
                        pltpu.VMEM((N, C), jnp.float32)],   # MHA head-output slab
    )

    return pl.pallas_call(
        kernel,
        out_shape=jax.ShapeDtypeStruct((N, nclass), jnp.float32),
        grid_spec=grid_spec,
        compiler_params=pltpu.CompilerParams(
            dimension_semantics=("arbitrary",),         # layer axis carries state
            vmem_limit_bytes=48 * 1024 * 1024),
    )(x0, pe, A, params['pe_aff'], params['pe_w'], params['pe_b'], e,
      params['gine_w'], params['gine_b'], params['qkv_w'], params['qkv_b'],
      params['wo'], params['bo'],
      params['mlp_w1'], params['mlp_b1'], params['mlp_w2'], params['mlp_b2'],
      params['bn'],
      params['head_w1'], params['head_b1'], params['head_w2'], params['head_b2'],
      params['head_w3'], params['head_b3'])


# ----------------------------------- main ------------------------------------

if __name__ == "__main__":
    # small, self-consistent sizes: C = CIN + PE_DIM = 32, heads = 4, dh = 8
    CIN, PE_DIM, NUM_LAYERS, NCLASS, HEADS = 24, 8, 2, 3, 4
    N_NODES, N_EDGES = 16, 48

    key = jax.random.PRNGKey(0)
    kp, kx, kpe, kei = jax.random.split(key, 4)

    params = init_params(kp, CIN, PE_DIM, NUM_LAYERS, NCLASS, heads=HEADS)

    x = jax.random.normal(kx, (1, N_NODES, CIN), dtype=jnp.float32)
    pe = jax.random.normal(kpe, (N_NODES, 20), dtype=jnp.float32)
    edge_index = jax.random.randint(kei, (2, N_EDGES), 0, N_NODES, dtype=jnp.int32)

    out = gps_forward(params, x, pe, edge_index)
    out = jax.block_until_ready(out)

    assert out.shape == (N_NODES, NCLASS)
    assert bool(jnp.all(jnp.isfinite(out)))
    # rows of log_softmax must exp-sum to 1
    assert bool(jnp.allclose(jnp.sum(jnp.exp(out), axis=1), 1.0, atol=1e-3))
    print("KERNEL_OK")
</pallas_src>

<mosaic_0001>
module attributes {stable_mosaic.version = 11 : i64} {
  func.func @kernel(%arg0: i32, %arg1: memref<16x24xf32, #tpu.memory_space<vmem>>, %arg2: memref<16x20xf32, #tpu.memory_space<vmem>>, %arg3: memref<16x16xbf16, #tpu.memory_space<vmem>>, %arg4: memref<2x20xf32, #tpu.memory_space<vmem>>, %arg5: memref<20x8xbf16, #tpu.memory_space<vmem>>, %arg6: memref<1x8xf32, #tpu.memory_space<vmem>>, %arg7: memref<1x32xf32, #tpu.memory_space<vmem>>, %arg8: memref<1x2x32x32xbf16, #tpu.memory_space<vmem>>, %arg9: memref<1x2x32xf32, #tpu.memory_space<vmem>>, %arg10: memref<1x12x32x8xbf16, #tpu.memory_space<vmem>>, %arg11: memref<1x12x8xf32, #tpu.memory_space<vmem>>, %arg12: memref<1x32x32xbf16, #tpu.memory_space<vmem>>, %arg13: memref<1x1x32xf32, #tpu.memory_space<vmem>>, %arg14: memref<1x32x64xbf16, #tpu.memory_space<vmem>>, %arg15: memref<1x1x64xf32, #tpu.memory_space<vmem>>, %arg16: memref<1x64x32xbf16, #tpu.memory_space<vmem>>, %arg17: memref<1x1x32xf32, #tpu.memory_space<vmem>>, %arg18: memref<1x6x32xf32, #tpu.memory_space<vmem>>, %arg19: memref<32x16xf32, #tpu.memory_space<vmem>>, %arg20: memref<1x16xf32, #tpu.memory_space<vmem>>, %arg21: memref<16x8xf32, #tpu.memory_space<vmem>>, %arg22: memref<1x8xf32, #tpu.memory_space<vmem>>, %arg23: memref<8x3xf32, #tpu.memory_space<vmem>>, %arg24: memref<1x3xf32, #tpu.memory_space<vmem>>, %arg25: memref<16x3xf32, #tpu.memory_space<vmem>>, %arg26: memref<16x32xf32, #tpu.memory_space<vmem>>, %arg27: memref<16x32xf32, #tpu.memory_space<vmem>>) attributes {dimension_semantics = [#tpu.dimension_semantics<arbitrary>], iteration_bounds = array<i64: 2>, scalar_prefetch = 0 : i64, scratch_operands = 2 : i64, tpu.core_type = #tpu.core_type<tc>, window_params = [{pipeline_mode = #tpu.pipeline_mode<synchronous>, transform_indices = @transform_0, window_bounds = array<i64: 16, 24>}, {pipeline_mode = #tpu.pipeline_mode<synchronous>, transform_indices = @transform_1, window_bounds = array<i64: 16, 20>}, {pipeline_mode = #tpu.pipeline_mode<synchronous>, transform_indices = @transform_2, window_bounds = array<i64: 16, 16>}, {pipeline_mode = #tpu.pipeline_mode<synchronous>, transform_indices = @transform_3, window_bounds = array<i64: 2, 20>}, {pipeline_mode = #tpu.pipeline_mode<synchronous>, transform_indices = @transform_4, window_bounds = array<i64: 20, 8>}, {pipeline_mode = #tpu.pipeline_mode<synchronous>, transform_indices = @transform_5, window_bounds = array<i64: 1, 8>}, {pipeline_mode = #tpu.pipeline_mode<synchronous>, transform_indices = @transform_6, window_bounds = array<i64: 1, 32>}, {transform_indices = @transform_7, window_bounds = array<i64: 1, 2, 32, 32>}, {transform_indices = @transform_8, window_bounds = array<i64: 1, 2, 32>}, {transform_indices = @transform_9, window_bounds = array<i64: 1, 12, 32, 8>}, {transform_indices = @transform_10, window_bounds = array<i64: 1, 12, 8>}, {transform_indices = @transform_11, window_bounds = array<i64: 1, 32, 32>}, {transform_indices = @transform_12, window_bounds = array<i64: 1, 1, 32>}, {transform_indices = @transform_13, window_bounds = array<i64: 1, 32, 64>}, {transform_indices = @transform_14, window_bounds = array<i64: 1, 1, 64>}, {transform_indices = @transform_15, window_bounds = array<i64: 1, 64, 32>}, {transform_indices = @transform_16, window_bounds = array<i64: 1, 1, 32>}, {transform_indices = @transform_17, window_bounds = array<i64: 1, 6, 32>}, {pipeline_mode = #tpu.pipeline_mode<synchronous>, transform_indices = @transform_18, window_bounds = array<i64: 32, 16>}, {pipeline_mode = #tpu.pipeline_mode<synchronous>, transform_indices = @transform_19, window_bounds = array<i64: 1, 16>}, {pipeline_mode = #tpu.pipeline_mode<synchronous>, transform_indices = @transform_20, window_bounds = array<i64: 16, 8>}, {pipeline_mode = #tpu.pipeline_mode<synchronous>, transform_indices = @transform_21, window_bounds = array<i64: 1, 8>}, {pipeline_mode = #tpu.pipeline_mode<synchronous>, transform_indices = @transform_22, window_bounds = array<i64: 8, 3>}, {pipeline_mode = #tpu.pipeline_mode<synchronous>, transform_indices = @transform_23, window_bounds = array<i64: 1, 3>}, {pipeline_mode = #tpu.pipeline_mode<synchronous>, transform_indices = @transform_24, window_bounds = array<i64: 16, 3>}]} {
    %c0_i32 = arith.constant 0 : i32
    %0 = arith.cmpi eq, %arg0, %c0_i32 : i32
    %1 = arith.extui %0 : i1 to i32
    %c0_i32_0 = arith.constant 0 : i32
    %2 = arith.cmpi ne, %1, %c0_i32_0 : i32
    scf.if %2 {
      %c0_161 = arith.constant 0 : index
      %c0_162 = arith.constant 0 : index
      %239 = vector.load %arg2[%c0_161, %c0_162] : memref<16x20xf32, #tpu.memory_space<vmem>>, vector<16x20xf32>
      %c0_163 = arith.constant 0 : index
      %c0_164 = arith.constant 0 : index
      %240 = vector.load %arg4[%c0_163, %c0_164] : memref<2x20xf32, #tpu.memory_space<vmem>>, vector<1x20xf32>
      %241 = vector.broadcast %240 : vector<1x20xf32> to vector<16x20xf32>
      %242 = arith.mulf %239, %241 : vector<16x20xf32>
      %c1_165 = arith.constant 1 : index
      %c0_166 = arith.constant 0 : index
      %243 = vector.load %arg4[%c1_165, %c0_166] : memref<2x20xf32, #tpu.memory_space<vmem>>, vector<1x20xf32>
      %244 = vector.broadcast %243 : vector<1x20xf32> to vector<16x20xf32>
      %245 = arith.addf %242, %244 : vector<16x20xf32>
      %246 = arith.truncf %245 : vector<16x20xf32> to vector<16x20xbf16>
      %c0_167 = arith.constant 0 : index
      %c0_168 = arith.constant 0 : index
      %247 = vector.load %arg5[%c0_167, %c0_168] : memref<20x8xbf16, #tpu.memory_space<vmem>>, vector<20x8xbf16>
      %cst_169 = arith.constant dense<0.000000e+00> : vector<16x8xf32>
      %248 = tpu.matmul %246, %247, %cst_169 {dimension_numbers = #tpu.dot_dimension_numbers<[1], [0], [0], [1], [0, 0, 1, 1], [], []>} : vector<16x20xbf16>, vector<20x8xbf16>, vector<16x8xf32> -> vector<16x8xf32>
      %c0_170 = arith.constant 0 : index
      %c0_171 = arith.constant 0 : index
      %249 = vector.load %arg6[%c0_170, %c0_171] : memref<1x8xf32, #tpu.memory_space<vmem>>, vector<1x8xf32>
      %250 = vector.broadcast %249 : vector<1x8xf32> to vector<16x8xf32>
      %251 = arith.addf %248, %250 : vector<16x8xf32>
      %c0_172 = arith.constant 0 : index
      %c0_173 = arith.constant 0 : index
      %252 = vector.load %arg1[%c0_172, %c0_173] : memref<16x24xf32, #tpu.memory_space<vmem>>, vector<16x24xf32>
      %c0_174 = arith.constant 0 : index
      %c0_175 = arith.constant 0 : index
      %253 = vector.load %arg26[%c0_174, %c0_175] : memref<16x32xf32, #tpu.memory_space<vmem>>, vector<16x24xf32>
      tpu.vector_store %arg26[%c0_174, %c0_175], %252 {strides = array<i32>} : memref<16x32xf32, #tpu.memory_space<vmem>>, vector<16x24xf32>,
      %c0_176 = arith.constant 0 : index
      %c24_177 = arith.constant 24 : index
      %254 = vector.load %arg26[%c0_176, %c24_177] : memref<16x32xf32, #tpu.memory_space<vmem>>, vector<16x8xf32>
      tpu.vector_store %arg26[%c0_176, %c24_177], %251 {strides = array<i32>} : memref<16x32xf32, #tpu.memory_space<vmem>>, vector<16x8xf32>,
    } else {
    }
    %c0 = arith.constant 0 : index
    %c0_1 = arith.constant 0 : index
    %3 = vector.load %arg26[%c0, %c0_1] : memref<16x32xf32, #tpu.memory_space<vmem>>, vector<16x32xf32>
    %4 = arith.truncf %3 : vector<16x32xf32> to vector<16x32xbf16>
    %c0_2 = arith.constant 0 : index
    %c0_3 = arith.constant 0 : index
    %c0_4 = arith.constant 0 : index
    %5 = vector.load %arg18[%c0_2, %c0_3, %c0_4] : memref<1x6x32xf32, #tpu.memory_space<vmem>>, vector<1x6x32xf32>
    %6 = vector.shape_cast %5 : vector<1x6x32xf32> to vector<6x32xf32>
    %c0_5 = arith.constant 0 : index
    %c0_6 = arith.constant 0 : index
    %7 = vector.load %arg7[%c0_5, %c0_6] : memref<1x32xf32, #tpu.memory_space<vmem>>, vector<1x32xf32>
    %8 = vector.broadcast %7 : vector<1x32xf32> to vector<16x32xf32>
    %9 = arith.addf %3, %8 : vector<16x32xf32>
    %cst = arith.constant 0.000000e+00 : f32
    %10 = vector.broadcast %cst : f32 to vector<16x32xf32>
    %11 = arith.maximumf %9, %10 : vector<16x32xf32>
    %12 = arith.truncf %11 : vector<16x32xf32> to vector<16x32xbf16>
    %c0_7 = arith.constant 0 : index
    %c0_8 = arith.constant 0 : index
    %13 = vector.load %arg3[%c0_7, %c0_8] : memref<16x16xbf16, #tpu.memory_space<vmem>>, vector<16x16xbf16>
    %cst_9 = arith.constant dense<0.000000e+00> : vector<16x32xf32>
    %14 = tpu.matmul %13, %12, %cst_9 {dimension_numbers = #tpu.dot_dimension_numbers<[1], [0], [0], [1], [0, 0, 1, 1], [], []>} : vector<16x16xbf16>, vector<16x32xbf16>, vector<16x32xf32> -> vector<16x32xf32>
    %15 = arith.addf %3, %14 : vector<16x32xf32>
    %16 = arith.truncf %15 : vector<16x32xf32> to vector<16x32xbf16>
    %c0_10 = arith.constant 0 : index
    %c0_11 = arith.constant 0 : index
    %c0_12 = arith.constant 0 : index
    %c0_13 = arith.constant 0 : index
    %17 = vector.load %arg8[%c0_10, %c0_11, %c0_12, %c0_13] : memref<1x2x32x32xbf16, #tpu.memory_space<vmem>>, vector<1x1x32x32xbf16>
    %18 = vector.shape_cast %17 : vector<1x1x32x32xbf16> to vector<32x32xbf16>
    %cst_14 = arith.constant dense<0.000000e+00> : vector<16x32xf32>
    %19 = tpu.matmul %16, %18, %cst_14 {dimension_numbers = #tpu.dot_dimension_numbers<[1], [0], [0], [1], [0, 0, 1, 1], [], []>} : vector<16x32xbf16>, vector<32x32xbf16>, vector<16x32xf32> -> vector<16x32xf32>
    %c0_15 = arith.constant 0 : index
    %c0_16 = arith.constant 0 : index
    %c0_17 = arith.constant 0 : index
    %20 = vector.load %arg9[%c0_15, %c0_16, %c0_17] : memref<1x2x32xf32, #tpu.memory_space<vmem>>, vector<1x1x32xf32>
    %21 = vector.shape_cast %20 : vector<1x1x32xf32> to vector<1x32xf32>
    %22 = vector.broadcast %21 : vector<1x32xf32> to vector<16x32xf32>
    %23 = arith.addf %19, %22 : vector<16x32xf32>
    %cst_18 = arith.constant 0.000000e+00 : f32
    %24 = vector.broadcast %cst_18 : f32 to vector<16x32xf32>
    %25 = arith.maximumf %23, %24 : vector<16x32xf32>
    %26 = arith.truncf %25 : vector<16x32xf32> to vector<16x32xbf16>
    %c0_19 = arith.constant 0 : index
    %c1 = arith.constant 1 : index
    %c0_20 = arith.constant 0 : index
    %c0_21 = arith.constant 0 : index
    %27 = vector.load %arg8[%c0_19, %c1, %c0_20, %c0_21] : memref<1x2x32x32xbf16, #tpu.memory_space<vmem>>, vector<1x1x32x32xbf16>
    %28 = vector.shape_cast %27 : vector<1x1x32x32xbf16> to vector<32x32xbf16>
    %cst_22 = arith.constant dense<0.000000e+00> : vector<16x32xf32>
    %29 = tpu.matmul %26, %28, %cst_22 {dimension_numbers = #tpu.dot_dimension_numbers<[1], [0], [0], [1], [0, 0, 1, 1], [], []>} : vector<16x32xbf16>, vector<32x32xbf16>, vector<16x32xf32> -> vector<16x32xf32>
    %c0_23 = arith.constant 0 : index
    %c1_24 = arith.constant 1 : index
    %c0_25 = arith.constant 0 : index
    %30 = vector.load %arg9[%c0_23, %c1_24, %c0_25] : memref<1x2x32xf32, #tpu.memory_space<vmem>>, vector<1x1x32xf32>
    %31 = vector.shape_cast %30 : vector<1x1x32xf32> to vector<1x32xf32>
    %32 = vector.broadcast %31 : vector<1x32xf32> to vector<16x32xf32>
    %33 = arith.addf %29, %32 : vector<16x32xf32>
    %34 = arith.addf %33, %3 : vector<16x32xf32>
    %35 = vector.extract_strided_slice %6 {offsets = [0, 0], sizes = [1, 32], strides = [1, 1]} : vector<6x32xf32> to vector<1x32xf32>
    %36 = vector.broadcast %35 : vector<1x32xf32> to vector<16x32xf32>
    %37 = arith.mulf %34, %36 : vector<16x32xf32>
    %38 = vector.extract_strided_slice %6 {offsets = [1, 0], sizes = [1, 32], strides = [1, 1]} : vector<6x32xf32> to vector<1x32xf32>
    %39 = vector.broadcast %38 : vector<1x32xf32> to vector<16x32xf32>
    %40 = arith.addf %37, %39 : vector<16x32xf32>
    %c0_26 = arith.constant 0 : index
    %c0_27 = arith.constant 0 : index
    %c0_28 = arith.constant 0 : index
    %c0_29 = arith.constant 0 : index
    %41 = vector.load %arg10[%c0_26, %c0_27, %c0_28, %c0_29] : memref<1x12x32x8xbf16, #tpu.memory_space<vmem>>, vector<1x1x32x8xbf16>
    %42 = vector.shape_cast %41 : vector<1x1x32x8xbf16> to vector<32x8xbf16>
    %cst_30 = arith.constant dense<0.000000e+00> : vector<16x8xf32>
    %43 = tpu.matmul %4, %42, %cst_30 {dimension_numbers = #tpu.dot_dimension_numbers<[1], [0], [0], [1], [0, 0, 1, 1], [], []>} : vector<16x32xbf16>, vector<32x8xbf16>, vector<16x8xf32> -> vector<16x8xf32>
    %c0_31 = arith.constant 0 : index
    %c0_32 = arith.constant 0 : index
    %c0_33 = arith.constant 0 : index
    %44 = vector.load %arg11[%c0_31, %c0_32, %c0_33] : memref<1x12x8xf32, #tpu.memory_space<vmem>>, vector<1x1x8xf32>
    %45 = vector.shape_cast %44 : vector<1x1x8xf32> to vector<1x8xf32>
    %46 = vector.broadcast %45 : vector<1x8xf32> to vector<16x8xf32>
    %47 = arith.addf %43, %46 : vector<16x8xf32>
    %48 = arith.truncf %47 : vector<16x8xf32> to vector<16x8xbf16>
    %c0_34 = arith.constant 0 : index
    %c4 = arith.constant 4 : index
    %c0_35 = arith.constant 0 : index
    %c0_36 = arith.constant 0 : index
    %49 = vector.load %arg10[%c0_34, %c4, %c0_35, %c0_36] : memref<1x12x32x8xbf16, #tpu.memory_space<vmem>>, vector<1x1x32x8xbf16>
    %50 = vector.shape_cast %49 : vector<1x1x32x8xbf16> to vector<32x8xbf16>
    %cst_37 = arith.constant dense<0.000000e+00> : vector<16x8xf32>
    %51 = tpu.matmul %4, %50, %cst_37 {dimension_numbers = #tpu.dot_dimension_numbers<[1], [0], [0], [1], [0, 0, 1, 1], [], []>} : vector<16x32xbf16>, vector<32x8xbf16>, vector<16x8xf32> -> vector<16x8xf32>
    %c0_38 = arith.constant 0 : index
    %c4_39 = arith.constant 4 : index
    %c0_40 = arith.constant 0 : index
    %52 = vector.load %arg11[%c0_38, %c4_39, %c0_40] : memref<1x12x8xf32, #tpu.memory_space<vmem>>, vector<1x1x8xf32>
    %53 = vector.shape_cast %52 : vector<1x1x8xf32> to vector<1x8xf32>
    %54 = vector.broadcast %53 : vector<1x8xf32> to vector<16x8xf32>
    %55 = arith.addf %51, %54 : vector<16x8xf32>
    %56 = arith.truncf %55 : vector<16x8xf32> to vector<16x8xbf16>
    %c0_41 = arith.constant 0 : index
    %c8 = arith.constant 8 : index
    %c0_42 = arith.constant 0 : index
    %c0_43 = arith.constant 0 : index
    %57 = vector.load %arg10[%c0_41, %c8, %c0_42, %c0_43] : memref<1x12x32x8xbf16, #tpu.memory_space<vmem>>, vector<1x1x32x8xbf16>
    %58 = vector.shape_cast %57 : vector<1x1x32x8xbf16> to vector<32x8xbf16>
    %cst_44 = arith.constant dense<0.000000e+00> : vector<16x8xf32>
    %59 = tpu.matmul %4, %58, %cst_44 {dimension_numbers = #tpu.dot_dimension_numbers<[1], [0], [0], [1], [0, 0, 1, 1], [], []>} : vector<16x32xbf16>, vector<32x8xbf16>, vector<16x8xf32> -> vector<16x8xf32>
    %c0_45 = arith.constant 0 : index
    %c8_46 = arith.constant 8 : index
    %c0_47 = arith.constant 0 : index
    %60 = vector.load %arg11[%c0_45, %c8_46, %c0_47] : memref<1x12x8xf32, #tpu.memory_space<vmem>>, vector<1x1x8xf32>
    %61 = vector.shape_cast %60 : vector<1x1x8xf32> to vector<1x8xf32>
    %62 = vector.broadcast %61 : vector<1x8xf32> to vector<16x8xf32>
    %63 = arith.addf %59, %62 : vector<16x8xf32>
    %64 = arith.truncf %63 : vector<16x8xf32> to vector<16x8xbf16>
    %cst_48 = arith.constant dense<0.000000e+00> : vector<16x16xf32>
    %65 = tpu.matmul %48, %56, %cst_48 {dimension_numbers = #tpu.dot_dimension_numbers<[1], [1], [0], [0], [0, 0, 1, 0], [], []>} : vector<16x8xbf16>, vector<16x8xbf16>, vector<16x16xf32> -> vector<16x16xf32>
    %cst_49 = arith.constant dense<0xFF800000> : vector<16xf32>
    %66 = vector.multi_reduction <maximumf>, %65, %cst_49 [1] : vector<16x16xf32> to vector<16xf32>
    %67 = vector.shape_cast %66 : vector<16xf32> to vector<16x1xf32>
    %68 = vector.broadcast %67 : vector<16x1xf32> to vector<16x16xf32>
    %69 = arith.subf %65, %68 : vector<16x16xf32>
    %70 = math.exp %69 : vector<16x16xf32>
    %cst_50 = arith.constant dense<0.000000e+00> : vector<16xf32>
    %71 = vector.multi_reduction <add>, %70, %cst_50 [1] : vector<16x16xf32> to vector<16xf32>
    %72 = vector.shape_cast %71 : vector<16xf32> to vector<16x1xf32>
    %73 = tpu.reciprocal %72 {approx = true} : vector<16x1xf32> -> vector<16x1xf32>
    %74 = vector.broadcast %73 : vector<16x1xf32> to vector<16x16xf32>
    %75 = arith.mulf %70, %74 : vector<16x16xf32>
    %76 = arith.truncf %75 : vector<16x16xf32> to vector<16x16xbf16>
    %cst_51 = arith.constant dense<0.000000e+00> : vector<16x8xf32>
    %77 = tpu.matmul %76, %64, %cst_51 {dimension_numbers = #tpu.dot_dimension_numbers<[1], [0], [0], [1], [0, 0, 1, 1], [], []>} : vector<16x16xbf16>, vector<16x8xbf16>, vector<16x8xf32> -> vector<16x8xf32>
    %c0_52 = arith.constant 0 : index
    %c0_53 = arith.constant 0 : index
    %78 = vector.load %arg27[%c0_52, %c0_53] : memref<16x32xf32, #tpu.memory_space<vmem>>, vector<16x8xf32>
    tpu.vector_store %arg27[%c0_52, %c0_53], %77 {strides = array<i32>} : memref<16x32xf32, #tpu.memory_space<vmem>>, vector<16x8xf32>,
    %c0_54 = arith.constant 0 : index
    %c1_55 = arith.constant 1 : index
    %c0_56 = arith.constant 0 : index
    %c0_57 = arith.constant 0 : index
    %79 = vector.load %arg10[%c0_54, %c1_55, %c0_56, %c0_57] : memref<1x12x32x8xbf16, #tpu.memory_space<vmem>>, vector<1x1x32x8xbf16>
    %80 = vector.shape_cast %79 : vector<1x1x32x8xbf16> to vector<32x8xbf16>
    %cst_58 = arith.constant dense<0.000000e+00> : vector<16x8xf32>
    %81 = tpu.matmul %4, %80, %cst_58 {dimension_numbers = #tpu.dot_dimension_numbers<[1], [0], [0], [1], [0, 0, 1, 1], [], []>} : vector<16x32xbf16>, vector<32x8xbf16>, vector<16x8xf32> -> vector<16x8xf32>
    %c0_59 = arith.constant 0 : index
    %c1_60 = arith.constant 1 : index
    %c0_61 = arith.constant 0 : index
    %82 = vector.load %arg11[%c0_59, %c1_60, %c0_61] : memref<1x12x8xf32, #tpu.memory_space<vmem>>, vector<1x1x8xf32>
    %83 = vector.shape_cast %82 : vector<1x1x8xf32> to vector<1x8xf32>
    %84 = vector.broadcast %83 : vector<1x8xf32> to vector<16x8xf32>
    %85 = arith.addf %81, %84 : vector<16x8xf32>
    %86 = arith.truncf %85 : vector<16x8xf32> to vector<16x8xbf16>
    %c0_62 = arith.constant 0 : index
    %c5 = arith.constant 5 : index
    %c0_63 = arith.constant 0 : index
    %c0_64 = arith.constant 0 : index
    %87 = vector.load %arg10[%c0_62, %c5, %c0_63, %c0_64] : memref<1x12x32x8xbf16, #tpu.memory_space<vmem>>, vector<1x1x32x8xbf16>
    %88 = vector.shape_cast %87 : vector<1x1x32x8xbf16> to vector<32x8xbf16>
    %cst_65 = arith.constant dense<0.000000e+00> : vector<16x8xf32>
    %89 = tpu.matmul %4, %88, %cst_65 {dimension_numbers = #tpu.dot_dimension_numbers<[1], [0], [0], [1], [0, 0, 1, 1], [], []>} : vector<16x32xbf16>, vector<32x8xbf16>, vector<16x8xf32> -> vector<16x8xf32>
    %c0_66 = arith.constant 0 : index
    %c5_67 = arith.constant 5 : index
    %c0_68 = arith.constant 0 : index
    %90 = vector.load %arg11[%c0_66, %c5_67, %c0_68] : memref<1x12x8xf32, #tpu.memory_space<vmem>>, vector<1x1x8xf32>
    %91 = vector.shape_cast %90 : vector<1x1x8xf32> to vector<1x8xf32>
    %92 = vector.broadcast %91 : vector<1x8xf32> to vector<16x8xf32>
    %93 = arith.addf %89, %92 : vector<16x8xf32>
    %94 = arith.truncf %93 : vector<16x8xf32> to vector<16x8xbf16>
    %c0_69 = arith.constant 0 : index
    %c9 = arith.constant 9 : index
    %c0_70 = arith.constant 0 : index
    %c0_71 = arith.constant 0 : index
    %95 = vector.load %arg10[%c0_69, %c9, %c0_70, %c0_71] : memref<1x12x32x8xbf16, #tpu.memory_space<vmem>>, vector<1x1x32x8xbf16>
    %96 = vector.shape_cast %95 : vector<1x1x32x8xbf16> to vector<32x8xbf16>
    %cst_72 = arith.constant dense<0.000000e+00> : vector<16x8xf32>
    %97 = tpu.matmul %4, %96, %cst_72 {dimension_numbers = #tpu.dot_dimension_numbers<[1], [0], [0], [1], [0, 0, 1, 1], [], []>} : vector<16x32xbf16>, vector<32x8xbf16>, vector<16x8xf32> -> vector<16x8xf32>
    %c0_73 = arith.constant 0 : index
    %c9_74 = arith.constant 9 : index
    %c0_75 = arith.constant 0 : index
    %98 = vector.load %arg11[%c0_73, %c9_74, %c0_75] : memref<1x12x8xf32, #tpu.memory_space<vmem>>, vector<1x1x8xf32>
    %99 = vector.shape_cast %98 : vector<1x1x8xf32> to vector<1x8xf32>
    %100 = vector.broadcast %99 : vector<1x8xf32> to vector<16x8xf32>
    %101 = arith.addf %97, %100 : vector<16x8xf32>
    %102 = arith.truncf %101 : vector<16x8xf32> to vector<16x8xbf16>
    %cst_76 = arith.constant dense<0.000000e+00> : vector<16x16xf32>
    %103 = tpu.matmul %86, %94, %cst_76 {dimension_numbers = #tpu.dot_dimension_numbers<[1], [1], [0], [0], [0, 0, 1, 0], [], []>} : vector<16x8xbf16>, vector<16x8xbf16>, vector<16x16xf32> -> vector<16x16xf32>
    %cst_77 = arith.constant dense<0xFF800000> : vector<16xf32>
    %104 = vector.multi_reduction <maximumf>, %103, %cst_77 [1] : vector<16x16xf32> to vector<16xf32>
    %105 = vector.shape_cast %104 : vector<16xf32> to vector<16x1xf32>
    %106 = vector.broadcast %105 : vector<16x1xf32> to vector<16x16xf32>
    %107 = arith.subf %103, %106 : vector<16x16xf32>
    %108 = math.exp %107 : vector<16x16xf32>
    %cst_78 = arith.constant dense<0.000000e+00> : vector<16xf32>
    %109 = vector.multi_reduction <add>, %108, %cst_78 [1] : vector<16x16xf32> to vector<16xf32>
    %110 = vector.shape_cast %109 : vector<16xf32> to vector<16x1xf32>
    %111 = tpu.reciprocal %110 {approx = true} : vector<16x1xf32> -> vector<16x1xf32>
    %112 = vector.broadcast %111 : vector<16x1xf32> to vector<16x16xf32>
    %113 = arith.mulf %108, %112 : vector<16x16xf32>
    %114 = arith.truncf %113 : vector<16x16xf32> to vector<16x16xbf16>
    %cst_79 = arith.constant dense<0.000000e+00> : vector<16x8xf32>
    %115 = tpu.matmul %114, %102, %cst_79 {dimension_numbers = #tpu.dot_dimension_numbers<[1], [0], [0], [1], [0, 0, 1, 1], [], []>} : vector<16x16xbf16>, vector<16x8xbf16>, vector<16x8xf32> -> vector<16x8xf32>
    %c0_80 = arith.constant 0 : index
    %c8_81 = arith.constant 8 : index
    %116 = vector.load %arg27[%c0_80, %c8_81] : memref<16x32xf32, #tpu.memory_space<vmem>>, vector<16x8xf32>
    tpu.vector_store %arg27[%c0_80, %c8_81], %115 {strides = array<i32>} : memref<16x32xf32, #tpu.memory_space<vmem>>, vector<16x8xf32>,
    %c0_82 = arith.constant 0 : index
    %c2 = arith.constant 2 : index
    %c0_83 = arith.constant 0 : index
    %c0_84 = arith.constant 0 : index
    %117 = vector.load %arg10[%c0_82, %c2, %c0_83, %c0_84] : memref<1x12x32x8xbf16, #tpu.memory_space<vmem>>, vector<1x1x32x8xbf16>
    %118 = vector.shape_cast %117 : vector<1x1x32x8xbf16> to vector<32x8xbf16>
    %cst_85 = arith.constant dense<0.000000e+00> : vector<16x8xf32>
    %119 = tpu.matmul %4, %118, %cst_85 {dimension_numbers = #tpu.dot_dimension_numbers<[1], [0], [0], [1], [0, 0, 1, 1], [], []>} : vector<16x32xbf16>, vector<32x8xbf16>, vector<16x8xf32> -> vector<16x8xf32>
    %c0_86 = arith.constant 0 : index
    %c2_87 = arith.constant 2 : index
    %c0_88 = arith.constant 0 : index
    %120 = vector.load %arg11[%c0_86, %c2_87, %c0_88] : memref<1x12x8xf32, #tpu.memory_space<vmem>>, vector<1x1x8xf32>
    %121 = vector.shape_cast %120 : vector<1x1x8xf32> to vector<1x8xf32>
    %122 = vector.broadcast %121 : vector<1x8xf32> to vector<16x8xf32>
    %123 = arith.addf %119, %122 : vector<16x8xf32>
    %124 = arith.truncf %123 : vector<16x8xf32> to vector<16x8xbf16>
    %c0_89 = arith.constant 0 : index
    %c6 = arith.constant 6 : index
    %c0_90 = arith.constant 0 : index
    %c0_91 = arith.constant 0 : index
    %125 = vector.load %arg10[%c0_89, %c6, %c0_90, %c0_91] : memref<1x12x32x8xbf16, #tpu.memory_space<vmem>>, vector<1x1x32x8xbf16>
    %126 = vector.shape_cast %125 : vector<1x1x32x8xbf16> to vector<32x8xbf16>
    %cst_92 = arith.constant dense<0.000000e+00> : vector<16x8xf32>
    %127 = tpu.matmul %4, %126, %cst_92 {dimension_numbers = #tpu.dot_dimension_numbers<[1], [0], [0], [1], [0, 0, 1, 1], [], []>} : vector<16x32xbf16>, vector<32x8xbf16>, vector<16x8xf32> -> vector<16x8xf32>
    %c0_93 = arith.constant 0 : index
    %c6_94 = arith.constant 6 : index
    %c0_95 = arith.constant 0 : index
    %128 = vector.load %arg11[%c0_93, %c6_94, %c0_95] : memref<1x12x8xf32, #tpu.memory_space<vmem>>, vector<1x1x8xf32>
    %129 = vector.shape_cast %128 : vector<1x1x8xf32> to vector<1x8xf32>
    %130 = vector.broadcast %129 : vector<1x8xf32> to vector<16x8xf32>
    %131 = arith.addf %127, %130 : vector<16x8xf32>
    %132 = arith.truncf %131 : vector<16x8xf32> to vector<16x8xbf16>
    %c0_96 = arith.constant 0 : index
    %c10 = arith.constant 10 : index
    %c0_97 = arith.constant 0 : index
    %c0_98 = arith.constant 0 : index
    %133 = vector.load %arg10[%c0_96, %c10, %c0_97, %c0_98] : memref<1x12x32x8xbf16, #tpu.memory_space<vmem>>, vector<1x1x32x8xbf16>
    %134 = vector.shape_cast %133 : vector<1x1x32x8xbf16> to vector<32x8xbf16>
    %cst_99 = arith.constant dense<0.000000e+00> : vector<16x8xf32>
    %135 = tpu.matmul %4, %134, %cst_99 {dimension_numbers = #tpu.dot_dimension_numbers<[1], [0], [0], [1], [0, 0, 1, 1], [], []>} : vector<16x32xbf16>, vector<32x8xbf16>, vector<16x8xf32> -> vector<16x8xf32>
    %c0_100 = arith.constant 0 : index
    %c10_101 = arith.constant 10 : index
    %c0_102 = arith.constant 0 : index
    %136 = vector.load %arg11[%c0_100, %c10_101, %c0_102] : memref<1x12x8xf32, #tpu.memory_space<vmem>>, vector<1x1x8xf32>
    %137 = vector.shape_cast %136 : vector<1x1x8xf32> to vector<1x8xf32>
    %138 = vector.broadcast %137 : vector<1x8xf32> to vector<16x8xf32>
    %139 = arith.addf %135, %138 : vector<16x8xf32>
    %140 = arith.truncf %139 : vector<16x8xf32> to vector<16x8xbf16>
    %cst_103 = arith.constant dense<0.000000e+00> : vector<16x16xf32>
    %141 = tpu.matmul %124, %132, %cst_103 {dimension_numbers = #tpu.dot_dimension_numbers<[1], [1], [0], [0], [0, 0, 1, 0], [], []>} : vector<16x8xbf16>, vector<16x8xbf16>, vector<16x16xf32> -> vector<16x16xf32>
    %cst_104 = arith.constant dense<0xFF800000> : vector<16xf32>
    %142 = vector.multi_reduction <maximumf>, %141, %cst_104 [1] : vector<16x16xf32> to vector<16xf32>
    %143 = vector.shape_cast %142 : vector<16xf32> to vector<16x1xf32>
    %144 = vector.broadcast %143 : vector<16x1xf32> to vector<16x16xf32>
    %145 = arith.subf %141, %144 : vector<16x16xf32>
    %146 = math.exp %145 : vector<16x16xf32>
    %cst_105 = arith.constant dense<0.000000e+00> : vector<16xf32>
    %147 = vector.multi_reduction <add>, %146, %cst_105 [1] : vector<16x16xf32> to vector<16xf32>
    %148 = vector.shape_cast %147 : vector<16xf32> to vector<16x1xf32>
    %149 = tpu.reciprocal %148 {approx = true} : vector<16x1xf32> -> vector<16x1xf32>
    %150 = vector.broadcast %149 : vector<16x1xf32> to vector<16x16xf32>
    %151 = arith.mulf %146, %150 : vector<16x16xf32>
    %152 = arith.truncf %151 : vector<16x16xf32> to vector<16x16xbf16>
    %cst_106 = arith.constant dense<0.000000e+00> : vector<16x8xf32>
    %153 = tpu.matmul %152, %140, %cst_106 {dimension_numbers = #tpu.dot_dimension_numbers<[1], [0], [0], [1], [0, 0, 1, 1], [], []>} : vector<16x16xbf16>, vector<16x8xbf16>, vector<16x8xf32> -> vector<16x8xf32>
    %c0_107 = arith.constant 0 : index
    %c16 = arith.constant 16 : index
    %154 = vector.load %arg27[%c0_107, %c16] : memref<16x32xf32, #tpu.memory_space<vmem>>, vector<16x8xf32>
    tpu.vector_store %arg27[%c0_107, %c16], %153 {strides = array<i32>} : memref<16x32xf32, #tpu.memory_space<vmem>>, vector<16x8xf32>,
    %c0_108 = arith.constant 0 : index
    %c3 = arith.constant 3 : index
    %c0_109 = arith.constant 0 : index
    %c0_110 = arith.constant 0 : index
    %155 = vector.load %arg10[%c0_108, %c3, %c0_109, %c0_110] : memref<1x12x32x8xbf16, #tpu.memory_space<vmem>>, vector<1x1x32x8xbf16>
    %156 = vector.shape_cast %155 : vector<1x1x32x8xbf16> to vector<32x8xbf16>
    %cst_111 = arith.constant dense<0.000000e+00> : vector<16x8xf32>
    %157 = tpu.matmul %4, %156, %cst_111 {dimension_numbers = #tpu.dot_dimension_numbers<[1], [0], [0], [1], [0, 0, 1, 1], [], []>} : vector<16x32xbf16>, vector<32x8xbf16>, vector<16x8xf32> -> vector<16x8xf32>
    %c0_112 = arith.constant 0 : index
    %c3_113 = arith.constant 3 : index
    %c0_114 = arith.constant 0 : index
    %158 = vector.load %arg11[%c0_112, %c3_113, %c0_114] : memref<1x12x8xf32, #tpu.memory_space<vmem>>, vector<1x1x8xf32>
    %159 = vector.shape_cast %158 : vector<1x1x8xf32> to vector<1x8xf32>
    %160 = vector.broadcast %159 : vector<1x8xf32> to vector<16x8xf32>
    %161 = arith.addf %157, %160 : vector<16x8xf32>
    %162 = arith.truncf %161 : vector<16x8xf32> to vector<16x8xbf16>
    %c0_115 = arith.constant 0 : index
    %c7 = arith.constant 7 : index
    %c0_116 = arith.constant 0 : index
    %c0_117 = arith.constant 0 : index
    %163 = vector.load %arg10[%c0_115, %c7, %c0_116, %c0_117] : memref<1x12x32x8xbf16, #tpu.memory_space<vmem>>, vector<1x1x32x8xbf16>
    %164 = vector.shape_cast %163 : vector<1x1x32x8xbf16> to vector<32x8xbf16>
    %cst_118 = arith.constant dense<0.000000e+00> : vector<16x8xf32>
    %165 = tpu.matmul %4, %164, %cst_118 {dimension_numbers = #tpu.dot_dimension_numbers<[1], [0], [0], [1], [0, 0, 1, 1], [], []>} : vector<16x32xbf16>, vector<32x8xbf16>, vector<16x8xf32> -> vector<16x8xf32>
    %c0_119 = arith.constant 0 : index
    %c7_120 = arith.constant 7 : index
    %c0_121 = arith.constant 0 : index
    %166 = vector.load %arg11[%c0_119, %c7_120, %c0_121] : memref<1x12x8xf32, #tpu.memory_space<vmem>>, vector<1x1x8xf32>
    %167 = vector.shape_cast %166 : vector<1x1x8xf32> to vector<1x8xf32>
    %168 = vector.broadcast %167 : vector<1x8xf32> to vector<16x8xf32>
    %169 = arith.addf %165, %168 : vector<16x8xf32>
    %170 = arith.truncf %169 : vector<16x8xf32> to vector<16x8xbf16>
    %c0_122 = arith.constant 0 : index
    %c11 = arith.constant 11 : index
    %c0_123 = arith.constant 0 : index
    %c0_124 = arith.constant 0 : index
    %171 = vector.load %arg10[%c0_122, %c11, %c0_123, %c0_124] : memref<1x12x32x8xbf16, #tpu.memory_space<vmem>>, vector<1x1x32x8xbf16>
    %172 = vector.shape_cast %171 : vector<1x1x32x8xbf16> to vector<32x8xbf16>
    %cst_125 = arith.constant dense<0.000000e+00> : vector<16x8xf32>
    %173 = tpu.matmul %4, %172, %cst_125 {dimension_numbers = #tpu.dot_dimension_numbers<[1], [0], [0], [1], [0, 0, 1, 1], [], []>} : vector<16x32xbf16>, vector<32x8xbf16>, vector<16x8xf32> -> vector<16x8xf32>
    %c0_126 = arith.constant 0 : index
    %c11_127 = arith.constant 11 : index
    %c0_128 = arith.constant 0 : index
    %174 = vector.load %arg11[%c0_126, %c11_127, %c0_128] : memref<1x12x8xf32, #tpu.memory_space<vmem>>, vector<1x1x8xf32>
    %175 = vector.shape_cast %174 : vector<1x1x8xf32> to vector<1x8xf32>
    %176 = vector.broadcast %175 : vector<1x8xf32> to vector<16x8xf32>
    %177 = arith.addf %173, %176 : vector<16x8xf32>
    %178 = arith.truncf %177 : vector<16x8xf32> to vector<16x8xbf16>
    %cst_129 = arith.constant dense<0.000000e+00> : vector<16x16xf32>
    %179 = tpu.matmul %162, %170, %cst_129 {dimension_numbers = #tpu.dot_dimension_numbers<[1], [1], [0], [0], [0, 0, 1, 0], [], []>} : vector<16x8xbf16>, vector<16x8xbf16>, vector<16x16xf32> -> vector<16x16xf32>
    %cst_130 = arith.constant dense<0xFF800000> : vector<16xf32>
    %180 = vector.multi_reduction <maximumf>, %179, %cst_130 [1] : vector<16x16xf32> to vector<16xf32>
    %181 = vector.shape_cast %180 : vector<16xf32> to vector<16x1xf32>
    %182 = vector.broadcast %181 : vector<16x1xf32> to vector<16x16xf32>
    %183 = arith.subf %179, %182 : vector<16x16xf32>
    %184 = math.exp %183 : vector<16x16xf32>
    %cst_131 = arith.constant dense<0.000000e+00> : vector<16xf32>
    %185 = vector.multi_reduction <add>, %184, %cst_131 [1] : vector<16x16xf32> to vector<16xf32>
    %186 = vector.shape_cast %185 : vector<16xf32> to vector<16x1xf32>
    %187 = tpu.reciprocal %186 {approx = true} : vector<16x1xf32> -> vector<16x1xf32>
    %188 = vector.broadcast %187 : vector<16x1xf32> to vector<16x16xf32>
    %189 = arith.mulf %184, %188 : vector<16x16xf32>
    %190 = arith.truncf %189 : vector<16x16xf32> to vector<16x16xbf16>
    %cst_132 = arith.constant dense<0.000000e+00> : vector<16x8xf32>
    %191 = tpu.matmul %190, %178, %cst_132 {dimension_numbers = #tpu.dot_dimension_numbers<[1], [0], [0], [1], [0, 0, 1, 1], [], []>} : vector<16x16xbf16>, vector<16x8xbf16>, vector<16x8xf32> -> vector<16x8xf32>
    %c0_133 = arith.constant 0 : index
    %c24 = arith.constant 24 : index
    %192 = vector.load %arg27[%c0_133, %c24] : memref<16x32xf32, #tpu.memory_space<vmem>>, vector<16x8xf32>
    tpu.vector_store %arg27[%c0_133, %c24], %191 {strides = array<i32>} : memref<16x32xf32, #tpu.memory_space<vmem>>, vector<16x8xf32>,
    %c0_134 = arith.constant 0 : index
    %c0_135 = arith.constant 0 : index
    %193 = vector.load %arg27[%c0_134, %c0_135] : memref<16x32xf32, #tpu.memory_space<vmem>>, vector<16x32xf32>
    %194 = arith.truncf %193 : vector<16x32xf32> to vector<16x32xbf16>
    %c0_136 = arith.constant 0 : index
    %c0_137 = arith.constant 0 : index
    %c0_138 = arith.constant 0 : index
    %195 = vector.load %arg12[%c0_136, %c0_137, %c0_138] : memref<1x32x32xbf16, #tpu.memory_space<vmem>>, vector<1x32x32xbf16>
    %196 = vector.shape_cast %195 : vector<1x32x32xbf16> to vector<32x32xbf16>
    %cst_139 = arith.constant dense<0.000000e+00> : vector<16x32xf32>
    %197 = tpu.matmul %194, %196, %cst_139 {dimension_numbers = #tpu.dot_dimension_numbers<[1], [0], [0], [1], [0, 0, 1, 1], [], []>} : vector<16x32xbf16>, vector<32x32xbf16>, vector<16x32xf32> -> vector<16x32xf32>
    %c0_140 = arith.constant 0 : index
    %c0_141 = arith.constant 0 : index
    %c0_142 = arith.constant 0 : index
    %198 = vector.load %arg13[%c0_140, %c0_141, %c0_142] : memref<1x1x32xf32, #tpu.memory_space<vmem>>, vector<1x1x32xf32>
    %199 = vector.shape_cast %198 : vector<1x1x32xf32> to vector<1x32xf32>
    %200 = vector.broadcast %199 : vector<1x32xf32> to vector<16x32xf32>
    %201 = arith.addf %197, %200 : vector<16x32xf32>
    %202 = arith.addf %201, %3 : vector<16x32xf32>
    %203 = vector.extract_strided_slice %6 {offsets = [2, 0], sizes = [1, 32], strides = [1, 1]} : vector<6x32xf32> to vector<1x32xf32>
    %204 = vector.broadcast %203 : vector<1x32xf32> to vector<16x32xf32>
    %205 = arith.mulf %202, %204 : vector<16x32xf32>
    %206 = vector.extract_strided_slice %6 {offsets = [3, 0], sizes = [1, 32], strides = [1, 1]} : vector<6x32xf32> to vector<1x32xf32>
    %207 = vector.broadcast %206 : vector<1x32xf32> to vector<16x32xf32>
    %208 = arith.addf %205, %207 : vector<16x32xf32>
    %209 = arith.addf %40, %208 : vector<16x32xf32>
    %210 = arith.truncf %209 : vector<16x32xf32> to vector<16x32xbf16>
    %c0_143 = arith.constant 0 : index
    %c0_144 = arith.constant 0 : index
    %c0_145 = arith.constant 0 : index
    %211 = vector.load %arg14[%c0_143, %c0_144, %c0_145] : memref<1x32x64xbf16, #tpu.memory_space<vmem>>, vector<1x32x64xbf16>
    %212 = vector.shape_cast %211 : vector<1x32x64xbf16> to vector<32x64xbf16>
    %cst_146 = arith.constant dense<0.000000e+00> : vector<16x64xf32>
    %213 = tpu.matmul %210, %212, %cst_146 {dimension_numbers = #tpu.dot_dimension_numbers<[1], [0], [0], [1], [0, 0, 1, 1], [], []>} : vector<16x32xbf16>, vector<32x64xbf16>, vector<16x64xf32> -> vector<16x64xf32>
    %c0_147 = arith.constant 0 : index
    %c0_148 = arith.constant 0 : index
    %c0_149 = arith.constant 0 : index
    %214 = vector.load %arg15[%c0_147, %c0_148, %c0_149] : memref<1x1x64xf32, #tpu.memory_space<vmem>>, vector<1x1x64xf32>
    %215 = vector.shape_cast %214 : vector<1x1x64xf32> to vector<1x64xf32>
    %216 = vector.broadcast %215 : vector<1x64xf32> to vector<16x64xf32>
    %217 = arith.addf %213, %216 : vector<16x64xf32>
    %cst_150 = arith.constant 0.000000e+00 : f32
    %218 = vector.broadcast %cst_150 : f32 to vector<16x64xf32>
    %219 = arith.maximumf %217, %218 : vector<16x64xf32>
    %220 = arith.truncf %219 : vector<16x64xf32> to vector<16x64xbf16>
    %c0_151 = arith.constant 0 : index
    %c0_152 = arith.constant 0 : index
    %c0_153 = arith.constant 0 : index
    %221 = vector.load %arg16[%c0_151, %c0_152, %c0_153] : memref<1x64x32xbf16, #tpu.memory_space<vmem>>, vector<1x64x32xbf16>
    %222 = vector.shape_cast %221 : vector<1x64x32xbf16> to vector<64x32xbf16>
    %cst_154 = arith.constant dense<0.000000e+00> : vector<16x32xf32>
    %223 = tpu.matmul %220, %222, %cst_154 {dimension_numbers = #tpu.dot_dimension_numbers<[1], [0], [0], [1], [0, 0, 1, 1], [], []>} : vector<16x64xbf16>, vector<64x32xbf16>, vector<16x32xf32> -> vector<16x32xf32>
    %c0_155 = arith.constant 0 : index
    %c0_156 = arith.constant 0 : index
    %c0_157 = arith.constant 0 : index
    %224 = vector.load %arg17[%c0_155, %c0_156, %c0_157] : memref<1x1x32xf32, #tpu.memory_space<vmem>>, vector<1x1x32xf32>
    %225 = vector.shape_cast %224 : vector<1x1x32xf32> to vector<1x32xf32>
    %226 = vector.broadcast %225 : vector<1x32xf32> to vector<16x32xf32>
    %227 = arith.addf %223, %226 : vector<16x32xf32>
    %228 = arith.addf %227, %209 : vector<16x32xf32>
    %229 = vector.extract_strided_slice %6 {offsets = [4, 0], sizes = [1, 32], strides = [1, 1]} : vector<6x32xf32> to vector<1x32xf32>
    %230 = vector.broadcast %229 : vector<1x32xf32> to vector<16x32xf32>
    %231 = arith.mulf %228, %230 : vector<16x32xf32>
    %232 = vector.extract_strided_slice %6 {offsets = [5, 0], sizes = [1, 32], strides = [1, 1]} : vector<6x32xf32> to vector<1x32xf32>
    %233 = vector.broadcast %232 : vector<1x32xf32> to vector<16x32xf32>
    %234 = arith.addf %231, %233 : vector<16x32xf32>
    %c0_158 = arith.constant 0 : index
    %c0_159 = arith.constant 0 : index
    %235 = vector.load %arg26[%c0_158, %c0_159] : memref<16x32xf32, #tpu.memory_space<vmem>>, vector<16x32xf32>
    tpu.vector_store %arg26[%c0_158, %c0_159], %234 {strides = array<i32>} : memref<16x32xf32, #tpu.memory_space<vmem>>, vector<16x32xf32>,
    %c1_i32 = arith.constant 1 : i32
    %236 = arith.cmpi eq, %arg0, %c1_i32 : i32
    %237 = arith.extui %236 : i1 to i32
    %c0_i32_160 = arith.constant 0 : i32
    %238 = arith.cmpi ne, %237, %c0_i32_160 : i32
    scf.if %238 {
      %c0_161 = arith.constant 0 : index
      %c0_162 = arith.constant 0 : index
      %239 = vector.load %arg19[%c0_161, %c0_162] : memref<32x16xf32, #tpu.memory_space<vmem>>, vector<32x16xf32>
      %cst_163 = arith.constant dense<0.000000e+00> : vector<16x16xf32>
      %240 = tpu.matmul %234, %239, %cst_163 {dimension_numbers = #tpu.dot_dimension_numbers<[1], [0], [0], [1], [0, 0, 1, 1], [], []>} : vector<16x32xf32>, vector<32x16xf32>, vector<16x16xf32> -> vector<16x16xf32>
      %c0_164 = arith.constant 0 : index
      %c0_165 = arith.constant 0 : index
      %241 = vector.load %arg20[%c0_164, %c0_165] : memref<1x16xf32, #tpu.memory_space<vmem>>, vector<1x16xf32>
      %242 = vector.broadcast %241 : vector<1x16xf32> to vector<16x16xf32>
      %243 = arith.addf %240, %242 : vector<16x16xf32>
      %cst_166 = arith.constant 0.000000e+00 : f32
      %244 = vector.broadcast %cst_166 : f32 to vector<16x16xf32>
      %245 = arith.maximumf %243, %244 : vector<16x16xf32>
      %c0_167 = arith.constant 0 : index
      %c0_168 = arith.constant 0 : index
      %246 = vector.load %arg21[%c0_167, %c0_168] : memref<16x8xf32, #tpu.memory_space<vmem>>, vector<16x8xf32>
      %cst_169 = arith.constant dense<0.000000e+00> : vector<16x8xf32>
      %247 = tpu.matmul %245, %246, %cst_169 {dimension_numbers = #tpu.dot_dimension_numbers<[1], [0], [0], [1], [0, 0, 1, 1], [], []>} : vector<16x16xf32>, vector<16x8xf32>, vector<16x8xf32> -> vector<16x8xf32>
      %c0_170 = arith.constant 0 : index
      %c0_171 = arith.constant 0 : index
      %248 = vector.load %arg22[%c0_170, %c0_171] : memref<1x8xf32, #tpu.memory_space<vmem>>, vector<1x8xf32>
      %249 = vector.broadcast %248 : vector<1x8xf32> to vector<16x8xf32>
      %250 = arith.addf %247, %249 : vector<16x8xf32>
      %cst_172 = arith.constant 0.000000e+00 : f32
      %251 = vector.broadcast %cst_172 : f32 to vector<16x8xf32>
      %252 = arith.maximumf %250, %251 : vector<16x8xf32>
      %c0_173 = arith.constant 0 : index
      %c0_174 = arith.constant 0 : index
      %253 = vector.load %arg23[%c0_173, %c0_174] : memref<8x3xf32, #tpu.memory_space<vmem>>, vector<8x3xf32>
      %cst_175 = arith.constant dense<0.000000e+00> : vector<16x3xf32>
      %254 = tpu.matmul %252, %253, %cst_175 {dimension_numbers = #tpu.dot_dimension_numbers<[1], [0], [0], [1], [0, 0, 1, 1], [], []>} : vector<16x8xf32>, vector<8x3xf32>, vector<16x3xf32> -> vector<16x3xf32>
      %c0_176 = arith.constant 0 : index
      %c0_177 = arith.constant 0 : index
      %255 = vector.load %arg24[%c0_176, %c0_177] : memref<1x3xf32, #tpu.memory_space<vmem>>, vector<1x3xf32>
      %256 = vector.broadcast %255 : vector<1x3xf32> to vector<16x3xf32>
      %257 = arith.addf %254, %256 : vector<16x3xf32>
      %cst_178 = arith.constant dense<0xFF800000> : vector<16xf32>
      %258 = vector.multi_reduction <maximumf>, %257, %cst_178 [1] : vector<16x3xf32> to vector<16xf32>
      %259 = vector.shape_cast %258 : vector<16xf32> to vector<16x1xf32>
      %260 = vector.broadcast %259 : vector<16x1xf32> to vector<16x3xf32>
      %261 = arith.subf %257, %260 : vector<16x3xf32>
      %262 = math.exp %261 : vector<16x3xf32>
      %cst_179 = arith.constant dense<0.000000e+00> : vector<16xf32>
      %263 = vector.multi_reduction <add>, %262, %cst_179 [1] : vector<16x3xf32> to vector<16xf32>
      %264 = vector.shape_cast %263 : vector<16xf32> to vector<16x1xf32>
      %265 = math.log %264 : vector<16x1xf32>
      %266 = vector.broadcast %265 : vector<16x1xf32> to vector<16x3xf32>
      %267 = arith.subf %261, %266 : vector<16x3xf32>
      %c0_180 = arith.constant 0 : index
      %c0_181 = arith.constant 0 : index
      %268 = vector.load %arg25[%c0_180, %c0_181] : memref<16x3xf32, #tpu.memory_space<vmem>>, vector<16x3xf32>
      tpu.vector_store %arg25[%c0_180, %c0_181], %267 {strides = array<i32>} : memref<16x3xf32, #tpu.memory_space<vmem>>, vector<16x3xf32>,
    } else {
    }
    return
  }
  func.func @transform_0(%arg0: i32) -> (i32, i32) {
    %c0_i32 = arith.constant 0 : i32
    %c0_i32_0 = arith.constant 0 : i32
    %c0_i32_1 = arith.constant 0 : i32
    return %c0_i32, %c0_i32_0 : i32, i32
  }
  func.func @transform_1(%arg0: i32) -> (i32, i32) {
    %c0_i32 = arith.constant 0 : i32
    %c0_i32_0 = arith.constant 0 : i32
    %c0_i32_1 = arith.constant 0 : i32
    return %c0_i32, %c0_i32_0 : i32, i32
  }
  func.func @transform_2(%arg0: i32) -> (i32, i32) {
    %c0_i32 = arith.constant 0 : i32
    %c0_i32_0 = arith.constant 0 : i32
    %c0_i32_1 = arith.constant 0 : i32
    return %c0_i32, %c0_i32_0 : i32, i32
  }
  func.func @transform_3(%arg0: i32) -> (i32, i32) {
    %c0_i32 = arith.constant 0 : i32
    %c0_i32_0 = arith.constant 0 : i32
    %c0_i32_1 = arith.constant 0 : i32
    return %c0_i32, %c0_i32_0 : i32, i32
  }
  func.func @transform_4(%arg0: i32) -> (i32, i32) {
    %c0_i32 = arith.constant 0 : i32
    %c0_i32_0 = arith.constant 0 : i32
    %c0_i32_1 = arith.constant 0 : i32
    return %c0_i32, %c0_i32_0 : i32, i32
  }
  func.func @transform_5(%arg0: i32) -> (i32, i32) {
    %c0_i32 = arith.constant 0 : i32
    %c0_i32_0 = arith.constant 0 : i32
    %c0_i32_1 = arith.constant 0 : i32
    return %c0_i32, %c0_i32_0 : i32, i32
  }
  func.func @transform_6(%arg0: i32) -> (i32, i32) {
    %c0_i32 = arith.constant 0 : i32
    %c0_i32_0 = arith.constant 0 : i32
    %c0_i32_1 = arith.constant 0 : i32
    return %c0_i32, %c0_i32_0 : i32, i32
  }
  func.func @transform_7(%arg0: i32) -> (i32, i32, i32, i32) {
    %c0_i32 = arith.constant 0 : i32
    %c0_i32_0 = arith.constant 0 : i32
    %c0_i32_1 = arith.constant 0 : i32
    %c0_i32_2 = arith.constant 0 : i32
    return %arg0, %c0_i32, %c0_i32_0, %c0_i32_1 : i32, i32, i32, i32
  }
  func.func @transform_8(%arg0: i32) -> (i32, i32, i32) {
    %c0_i32 = arith.constant 0 : i32
    %c0_i32_0 = arith.constant 0 : i32
    %c0_i32_1 = arith.constant 0 : i32
    return %arg0, %c0_i32, %c0_i32_0 : i32, i32, i32
  }
  func.func @transform_9(%arg0: i32) -> (i32, i32, i32, i32) {
    %c0_i32 = arith.constant 0 : i32
    %c0_i32_0 = arith.constant 0 : i32
    %c0_i32_1 = arith.constant 0 : i32
    %c0_i32_2 = arith.constant 0 : i32
    return %arg0, %c0_i32, %c0_i32_0, %c0_i32_1 : i32, i32, i32, i32
  }
  func.func @transform_10(%arg0: i32) -> (i32, i32, i32) {
    %c0_i32 = arith.constant 0 : i32
    %c0_i32_0 = arith.constant 0 : i32
    %c0_i32_1 = arith.constant 0 : i32
    return %arg0, %c0_i32, %c0_i32_0 : i32, i32, i32
  }
  func.func @transform_11(%arg0: i32) -> (i32, i32, i32) {
    %c0_i32 = arith.constant 0 : i32
    %c0_i32_0 = arith.constant 0 : i32
    %c0_i32_1 = arith.constant 0 : i32
    return %arg0, %c0_i32, %c0_i32_0 : i32, i32, i32
  }
  func.func @transform_12(%arg0: i32) -> (i32, i32, i32) {
    %c0_i32 = arith.constant 0 : i32
    %c0_i32_0 = arith.constant 0 : i32
    %c0_i32_1 = arith.constant 0 : i32
    return %arg0, %c0_i32, %c0_i32_0 : i32, i32, i32
  }
  func.func @transform_13(%arg0: i32) -> (i32, i32, i32) {
    %c0_i32 = arith.constant 0 : i32
    %c0_i32_0 = arith.constant 0 : i32
    %c0_i32_1 = arith.constant 0 : i32
    return %arg0, %c0_i32, %c0_i32_0 : i32, i32, i32
  }
  func.func @transform_14(%arg0: i32) -> (i32, i32, i32) {
    %c0_i32 = arith.constant 0 : i32
    %c0_i32_0 = arith.constant 0 : i32
    %c0_i32_1 = arith.constant 0 : i32
    return %arg0, %c0_i32, %c0_i32_0 : i32, i32, i32
  }
  func.func @transform_15(%arg0: i32) -> (i32, i32, i32) {
    %c0_i32 = arith.constant 0 : i32
    %c0_i32_0 = arith.constant 0 : i32
    %c0_i32_1 = arith.constant 0 : i32
    return %arg0, %c0_i32, %c0_i32_0 : i32, i32, i32
  }
  func.func @transform_16(%arg0: i32) -> (i32, i32, i32) {
    %c0_i32 = arith.constant 0 : i32
    %c0_i32_0 = arith.constant 0 : i32
    %c0_i32_1 = arith.constant 0 : i32
    return %arg0, %c0_i32, %c0_i32_0 : i32, i32, i32
  }
  func.func @transform_17(%arg0: i32) -> (i32, i32, i32) {
    %c0_i32 = arith.constant 0 : i32
    %c0_i32_0 = arith.constant 0 : i32
    %c0_i32_1 = arith.constant 0 : i32
    return %arg0, %c0_i32, %c0_i32_0 : i32, i32, i32
  }
  func.func @transform_18(%arg0: i32) -> (i32, i32) {
    %c0_i32 = arith.constant 0 : i32
    %c0_i32_0 = arith.constant 0 : i32
    %c0_i32_1 = arith.constant 0 : i32
    return %c0_i32, %c0_i32_0 : i32, i32
  }
  func.func @transform_19(%arg0: i32) -> (i32, i32) {
    %c0_i32 = arith.constant 0 : i32
    %c0_i32_0 = arith.constant 0 : i32
    %c0_i32_1 = arith.constant 0 : i32
    return %c0_i32, %c0_i32_0 : i32, i32
  }
  func.func @transform_20(%arg0: i32) -> (i32, i32) {
    %c0_i32 = arith.constant 0 : i32
    %c0_i32_0 = arith.constant 0 : i32
    %c0_i32_1 = arith.constant 0 : i32
    return %c0_i32, %c0_i32_0 : i32, i32
  }
  func.func @transform_21(%arg0: i32) -> (i32, i32) {
    %c0_i32 = arith.constant 0 : i32
    %c0_i32_0 = arith.constant 0 : i32
    %c0_i32_1 = arith.constant 0 : i32
    return %c0_i32, %c0_i32_0 : i32, i32
  }
  func.func @transform_22(%arg0: i32) -> (i32, i32) {
    %c0_i32 = arith.constant 0 : i32
    %c0_i32_0 = arith.constant 0 : i32
    %c0_i32_1 = arith.constant 0 : i32
    return %c0_i32, %c0_i32_0 : i32, i32
  }
  func.func @transform_23(%arg0: i32) -> (i32, i32) {
    %c0_i32 = arith.constant 0 : i32
    %c0_i32_0 = arith.constant 0 : i32
    %c0_i32_1 = arith.constant 0 : i32
    return %c0_i32, %c0_i32_0 : i32, i32
  }
  func.func @transform_24(%arg0: i32) -> (i32, i32) {
    %c0_i32 = arith.constant 0 : i32
    %c0_i32_0 = arith.constant 0 : i32
    %c0_i32_1 = arith.constant 0 : i32
    return %c0_i32, %c0_i32_0 : i32, i32
  }
}

</mosaic_0001>

<bundles_post_ra>
// kernel: tpu_custom_call.1
= control target key start
LH: loop header
LB: loop body
LE: loop exit
PB: predicated region body
PF: predicated region fallthrough
CT: control target
= control target key end

     0   :  { %s4325_s0 = inlined_call_operand.vmem [shape: f32[16,24], index: 0, kind: input, shape index: {}]   ;;  %s4326_s1 = inlined_call_operand.vmem [shape: f32[16,20], index: 1, kind: input, shape index: {}]   ;;  %s4327_s2 = inlined_call_operand.vmem [shape: bf16[16,16], index: 2, kind: input, shape index: {}]   ;;  %s4328_s3 = inlined_call_operand.vmem [shape: f32[2,20], index: 3, kind: input, shape index: {}]   ;;  %s4329_s4 = inlined_call_operand.vmem [shape: bf16[20,8], index: 4, kind: input, shape index: {}]   ;;  %s4330_s5 = inlined_call_operand.vmem [shape: f32[1,8], index: 5, kind: input, shape index: {}]   ;;  %s4331_s6 = inlined_call_operand.vmem [shape: f32[1,32], index: 6, kind: input, shape index: {}]   ;;  %s4332_s7 = inlined_call_operand.vmem [shape: bf16[2,2,32,32], index: 7, kind: input, shape index: {}]   ;;  %s4333_s8 = inlined_call_operand.vmem [shape: f32[2,2,32], index: 8, kind: input, shape index: {}]   ;;  %s4334_s9 = inlined_call_operand.vmem [shape: bf16[2,12,32,8], index: 9, kind: input, shape index: {}]   ;;  %s4335_s10 = inlined_call_operand.vmem [shape: f32[2,12,8], index: 10, kind: input, shape index: {}]   ;;  %s4336_s11 = inlined_call_operand.vmem [shape: bf16[2,32,32], index: 11, kind: input, shape index: {}]   ;;  %s4337_s12 = inlined_call_operand.vmem [shape: f32[2,1,32], index: 12, kind: input, shape index: {}]   ;;  %s4338_s13 = inlined_call_operand.vmem [shape: bf16[2,32,64], index: 13, kind: input, shape index: {}]   ;;  %s4339_s14 = inlined_call_operand.vmem [shape: f32[2,1,64], index: 14, kind: input, shape index: {}]   ;;  %s4340_s15 = inlined_call_operand.vmem [shape: bf16[2,64,32], index: 15, kind: input, shape index: {}]   ;;  %s4341_s16 = inlined_call_operand.vmem [shape: f32[2,1,32], index: 16, kind: input, shape index: {}]   ;;  %s4342_s17 = inlined_call_operand.vmem [shape: f32[2,6,32], index: 17, kind: input, shape index: {}]   ;;  %s4343_s18 = inlined_call_operand.vmem [shape: f32[32,16], index: 18, kind: input, shape index: {}]   ;;  %s4344_s19 = inlined_call_operand.vmem [shape: f32[1,16], index: 19, kind: input, shape index: {}]   ;;  %s4345_s20 = inlined_call_operand.vmem [shape: f32[16,8], index: 20, kind: input, shape index: {}]   ;;  %s4346_s21 = inlined_call_operand.vmem [shape: f32[1,8], index: 21, kind: input, shape index: {}]   ;;  %s4347_s22 = inlined_call_operand.vmem [shape: f32[8,3], index: 22, kind: input, shape index: {}]   ;;  %s4348_s23 = inlined_call_operand.vmem [shape: f32[1,3], index: 23, kind: input, shape index: {}]   ;;  %s4349_s24 = inlined_call_operand.vmem [shape: f32[16,3], index: 24, kind: output, shape index: {}]  }
   0x1   :  { %4358 = sst [smem:[#allocation5_spill]] %s4325_s0 }
   0x2   :  { %4359 = sst [smem:[#allocation6_spill]] %s4326_s1 }
   0x3   :  { %4360 = sst [smem:[#allocation7_spill]] %s4327_s2 }
   0x4   :  { %4361 = sst [smem:[#allocation8_spill]] %s4328_s3 }
   0x5   :  { %4362 = sst [smem:[#allocation9_spill]] %s4329_s4 }
   0x6   :  { %4363 = sst [smem:[#allocation10_spill]] %s4330_s5  ;;  %s3922_s5 = smov 0  }
   0x7   :  { %4364 = sst [smem:[#allocation11_spill]] %s4331_s6 }
   0x8   :  { %4365 = sst [smem:[#allocation12_spill]] %s4332_s7 }
   0x9   :  { %4366 = sst [smem:[#allocation13_spill]] %s4333_s8 }
   0xa   :  { %4367 = sst [smem:[#allocation14_spill]] %s4335_s10 }
   0xb   :  { %4368 = sst [smem:[#allocation15_spill]] %s4336_s11 }
   0xc   :  { %4369 = sst [smem:[#allocation16_spill]] %s4343_s18 }
   0xd   :  { %4370 = sst [smem:[#allocation17_spill]] %s4344_s19 }
   0xe   :  { %4371 = sst [smem:[#allocation18_spill]] %s4345_s20 }
   0xf   :  { %4372 = sst [smem:[#allocation19_spill]] %s4346_s21 }
  0x10   :  { %4373 = sst [smem:[#allocation20_spill]] %s4347_s22 }
  0x11   :  { %4374 = sst [smem:[#allocation21_spill]] %s4348_s23 }
  0x12   :  { %4375 = sst [smem:[#allocation22_spill]] %s4349_s24 }
  0x13 LB: > { %4376 = sst [smem:[#allocation4_spill]] %s3787_s5  ;;  %s3928_s26 = sadd.s32 4294967295, %s3787_s5   ;;  %s3787_s5 = sphi %s3922_s5, %s34_s5  }
  0x14   : > { %p3192_p0 = scmp.ge.s32.totalorder %s3787_s5, 1  ;;  %p749_p1 = scmp.lt.s32.totalorder %s3787_s5, 3 }
  0x16   : > { %p750_p2 = pnand %p3192_p0, %p749_p1 }
  0x17   : > { %p852_p3 = scmp.lt.s32.totalorder (!%p750_p2), %s3928_s26, 1  ;;  %s4377_s0 = sld [smem:[#allocation12_spill]] (!%p750_p2) }
  0x18   : > { %753 = sbr.rel (%p750_p2) target bundleno = 5880 (0x16f8), region = 116  ;;  %s4378_s25 = sld [smem:[#allocation13_spill]] (!%p750_p2) }
  0x19   : > { %s4379_s10 = sld [smem:[#allocation14_spill]] (!%p750_p2)  ;;  %s4380_s11 = sld [smem:[#allocation15_spill]] (!%p750_p2) }
  0x1a   : > { %p3206_p4 = scmp.ne.s32.totalorder (!%p750_p2), %s3928_s26, 0 }
  0x1f   : > { %s3934_s27 = scalar_select %p852_p3, %s3928_s26, 1 }
  0x20   : > { %v3789_v1 = vmov (!%p3206_p4), 0.0   ;;  %vm944_vm0 = vcmask (!%p3206_p4), 1041408   ;;  %s4382_s3 = sld [smem:[#allocation6_spill]] (!%p3206_p4)  ;;  %vm3790_vm1 = vmmov (!%p3206_p4), 0   ;;  %vm940_vm2 = vcmask (!%p3206_p4), 162816   ;;  %s4384_s22 = sld [smem:[#allocation5_spill]] (!%p3206_p4) }
  0x21   : > { %s3354_s28 = sshll.u32 %s3934_s27, 5  ;;  %s3195_s6 = sshll.u32 %s3934_s27, 1  ;;  %3446 = vmatprep.subr.bf16.mxu0 (!%p3206_p4), %v3789_v1  ;;  %3450 = vmatprep.mubr.msk.bf16.mxu0 (!%p3206_p4), %vm3790_vm1, %v3789_v1  ;;  %vm991_vm3 = vcmask (!%p3206_p4), 195584   ;;  %vm1002_vm4 = vcmask (!%p3206_p4), 261312  }
  0x22   : > { %s3941_s7 = scalar_lea.vmem %s4377_s0, %s3354_s28  ;;  %s3946_s8 = scalar_lea.vmem %s4378_s25, %s3195_s6 }
  0x23   : > { %s3683_s4 = smul.u32 192, %s3934_s27  ;;  %s3355_s1 = sshll.u32 %s3934_s27, 4 }
  0x24   : > { %s3953_s23 = scalar_lea.vmem %s4379_s10, %s3355_s1  ;;  %s3958_s19 = scalar_lea.vmem %s4380_s11, %s3355_s1 }
  0x25   : > { %s3963_s0 = scalar_lea.vmem %s4334_s9, %s3683_s4  ;;  %s3972_s24 = scalar_lea.vmem %s4338_s13, %s3355_s1 }
  0x26   : > { %s886_s21 = scalar_lea.vmem %s4339_s14, %s3934_s27  ;;  %s3981_s18 = scalar_lea.vmem %s4340_s15, %s3354_s28  ;;  %v904_v3 = vld [vmem:[%s4382_s3] sm:$0xff] (!%p3206_p4)  ;;  %v905_v4 = vld [vmem:[%s4382_s3 + $0x8] sm:$0xff] (!%p3206_p4) }
  0x27   : > { %s894_s29 = scalar_lea.vmem %s4341_s16, %s3934_s27  ;;  %s3205_s30 = sshll.u32 %s3934_s27, 3  ;;  %v989_v13 = vld [vmem:[%s4384_s22] sm:$0xff] (!%p3206_p4)  ;;  %v990_v14 = vld [vmem:[%s4384_s22 + $0x8] sm:$0xff] (!%p3206_p4) }
  0x28   : > { %s3991_s20 = scalar_lea.vmem %s4342_s17, %s3205_s30  ;;  %903 = sbr.rel (%p3206_p4) target bundleno = 389 (0x185), region = 120  ;;  %992 = vst.msk [vmem:[#allocation2] sm:$0xff] (!%p3206_p4), %vm991_vm3, %v989_v13  ;;  %993 = vst.msk [vmem:[#allocation2 + $0x8] sm:$0xff] (!%p3206_p4), %vm991_vm3, %v990_v14 }
  0x29   : > { %s4381_s25 = sld [smem:[#allocation9_spill]] (!%p3206_p4)  ;;  %s4383_s10 = sld [smem:[#allocation8_spill]] (!%p3206_p4) }
  0x2a   : > { %s4385_s1 = sld [smem:[#allocation10_spill]] (!%p3206_p4)  ;;  %s3791_s11 = smov (!%p3206_p4), 24  }
  0x2f   : > { %v3700_v0 = vld [vmem:[%s4381_s25] sm:$0xff]   ;;  %v3701_v2 = vld [vmem:[%s4381_s25 + $0x8] ss:$0 sps:$4 sm:$0x33]  }
  0x30   : > { %3447 = vmatpush3.bf16.msra.mxu0 %v3700_v0  ;;  %v3207_v5 = vld [vmem:[%s4383_s10] ss:$0 sm:$0xff]  ;;  %v946_v6 = vsel %vm944_vm0, %v3701_v2, 0  ;;  %v3208_v9 = vld [vmem:[%s4383_s10 + $0x1] ss:$0 sm:$0xff] }
  0x31   : > { %3448 = vmatprep.subr.bf16.mxu0 %v3789_v1  ;;  %v911_v7 = vmul.f32 %v3207_v5, %v904_v3  ;;  %v912_v8 = vmul.f32 %v3207_v5, %v905_v4  ;;  %v3209_v15 = vld [vmem:[%s4385_s1] ss:$0 sm:$0xff] }
  0x33   : > { %v918_v10 = vadd.f32 %v3208_v9, %v911_v7  ;;  %v919_v11 = vadd.f32 %v3208_v9, %v912_v8 }
  0x34   : > { %3449 = vmatpush3.bf16.msra.mxu0 %v946_v6 }
  0x35   : > { %v920_v12 = vpack.c.bf16 %v919_v11, %v918_v10 }
  0x37   : > { %3451 = vmatmul.mubr.msk.bf16.vlgmr.msra.gmra.mrb[0].mxu0 %vm940_vm2, %v920_v12 }
 0x10a   : > { %v982_v16 = vpop.f32.mrb[0].mxu0 }
 0x10b   : > { %v983_v17 = vadd.f32 %v3209_v15, %v982_v16  ;;  %v3452_v18 = vpop.f32.mrb[1].mxu0 }
 0x10c   : > { %v985_v19 = vpop.f32.mrb[2].mxu0 }
 0x10d   : > { %996 = vrot.lane.b32.xlu0 %v983_v17, %s3791_s11  ;;  %v3453_v20 = vpop.f32.mrb[3].mxu0  ;;  %v986_v21 = vadd.f32 %v3209_v15, %v985_v19 }
 0x111   : > { %998 = vrot.lane.b32.xlu0 %v986_v21, %s3791_s11 }
 0x17f   : > { %v997_v22 = vpop.permute.xlu0 %996 }
 0x180   : > { %1003 = vst.msk [vmem:[#allocation2] sm:$0xff] %vm1002_vm4, %v997_v22 }
 0x183   : > { %v999_v23 = vpop.permute.xlu0 %998 }
 0x184   : > { %1004 = vst.msk [vmem:[#allocation2 + $0x8] sm:$0xff] %vm1002_vm4, %v999_v23 }
 0x185 PF: > { %s4386_s4 = sld [smem:[#allocation11_spill]]  ;;  %v3792_v27 = vmov 0.0   ;;  %vm3793_vm5 = vmmov 0   ;;  %vm1028_vm6 = vcmask 130048   ;;  %s4387_s6 = sld [smem:[#allocation7_spill]]  ;;  %v3703_v34 = vld [vmem:[%s3941_s7] sm:$0xff]  }
 0x186   : > { %3454 = vmatprep.subr.bf16.mxu0 %v3792_v27  ;;  %3456 = vmatprep.mubr.msk.bf16.mxu0 %vm3793_vm5, %v3792_v27  ;;  %v3704_v35 = vld [vmem:[%s3941_s7 + $0x8] sm:$0xff]   ;;  %vm1097_vm7 = vcmask 261120   ;;  %v3705_v43 = vld [vmem:[%s3941_s7 + $0x10] sm:$0xff]   ;;  %v3706_v44 = vld [vmem:[%s3941_s7 + $0x18] sm:$0xff]   ;;  %vm1419_vm8 = vcmask 64512   ;;  %s3794_s7 = smov 8   ;;  %s4388_s1 = scalar_lea.vmem %s4337_s12, %s3934_s27 }
 0x187   : > { %v1005_v24 = vld [vmem:[#allocation2] sm:$0xff]  ;;  %3476 = vmatprep.subr.bf16.mxu1 %v3792_v27  ;;  %3480 = vmatprep.mubr.msk.bf16.mxu1 %vm3793_vm5, %v3792_v27  ;;  %v3710_v46 = vld [vmem:[%s3963_s0 + $0x8] sm:$0xff]   ;;  %vm1850_vm9 = vcmask 130112   ;;  %vm2167_vm10 = vcmask 195712   ;;  %vm2484_vm11 = vcmask 261312   ;;  %vm2683_vm12 = vcmask 523264  }
 0x188   : > { %v3709_v45 = vld [vmem:[%s3963_s0] sm:$0xff]   ;;  %v3708_v59 = vld [vmem:[%s3963_s0 + $0x48] sm:$0xff]   ;;  %p3342_p5 = scmp.ne.s32.totalorder %s3928_s26, 1 }
 0x189   : > { %3477 = vmatpush3.bf16.msra.mxu1 %v3709_v45  ;;  %v3216_v48 = vld [vmem:[%s3946_s8] ss:$0 sm:$0xff]  ;;  %v3236_v8 = vld [vmem:[%s3953_s23 + $0x4] ss:$0 sm:$0xff]  ;;  %v3712_v18 = vld [vmem:[%s3963_s0 + $0x88] sm:$0xff]   ;;  %s4392_s11 = sld [smem:[#allocation20_spill]] (!%p3342_p5) }
 0x18a   : > { %3478 = vmatprep.subr.bf16.mxu1 %v3792_v27  ;;  %v3707_v57 = vld [vmem:[%s3963_s0 + $0x40] sm:$0xff]   ;;  %v3716_v45 = vld [vmem:[%s3963_s0 + $0x18] sm:$0xff]   ;;  %s4393_s28 = sld [smem:[#allocation19_spill]] (!%p3342_p5)  ;;  %s4394_s2 = sld [smem:[#allocation21_spill]] (!%p3342_p5)  ;;  %vm3023_vm13 = vcmask (!%p3342_p5), 23552  }
 0x18b   : > { %v1006_v25 = vld [vmem:[#allocation2 + $0x8] sm:$0xff]  ;;  %v3213_v26 = vld [vmem:[%s4386_s4] ss:$0 sm:$0xff]  ;;  %s4395_s26 = sld [smem:[#allocation22_spill]] (!%p3342_p5) }
 0x18c   : > { %v1016_v28 = vadd.f32 %v3213_v26, %v1005_v24  ;;  %v1017_v29 = vadd.f32 %v3213_v26, %v1006_v25  ;;  %v3702_v32 = vld [vmem:[%s4387_s6] sm:$0xff]   ;;  %v4051_v47 = vpack.c.bf16 %v1006_v25, %v1005_v24 }
 0x18d   : > { %3479 = vmatpush3.bf16.msra.mxu1 %v3710_v46  ;;  %v3228_v60 = vld [vmem:[%s3953_s23] ss:$0 sm:$0xff] }
 0x18e   : > { %v1018_v30 = vmax.f32 %v1016_v28, 0.0  ;;  %v1019_v31 = vmax.f32 %v1017_v29, 0.0  ;;  %3492 = vmatprep.subr.bf16.mxu1 %v3792_v27  ;;  %v3711_v17 = vld [vmem:[%s3963_s0 + $0x80] sm:$0xff]  }
 0x190   : > { %v1020_v33 = vpack.c.bf16 %v1019_v31, %v1018_v30  ;;  %3481 = vmatmul.mubr.msk.bf16.vlgmr.msra.gmra.mrb[0].mxu1 %vm1097_vm7, %v4051_v47 }
 0x191   : > { %3496 = vmatprep.mubr.msk.bf16.mxu1 %vm3793_vm5, %v3792_v27  ;;  %3493 = vmatpush3.bf16.msra.mxu1 %v3711_v17 }
 0x192   : > { %3455 = vmatpush3.bf16.msra.mxu0 %v1020_v33  ;;  %3494 = vmatprep.subr.bf16.mxu1 %v3792_v27 }
 0x193   : > { %3460 = vmatprep.subr.bf16.mxu0 %v3792_v27 }
 0x195   : > { %3457 = vmatmul.mubr.msk.bf16.vlgmr.msra.gmra.mrb[0].mxu0 %vm1028_vm6, %v3702_v32  ;;  %3495 = vmatpush3.bf16.msra.mxu1 %v3712_v18 }
 0x196   : > { %3464 = vmatprep.mubr.msk.bf16.mxu0 %vm3793_vm5, %v3792_v27  ;;  %3461 = vmatpush3.bf16.msra.mxu0 %v3703_v34 }
 0x197   : > { %3462 = vmatprep.subr.bf16.mxu0 %v3792_v27  ;;  %3506 = vmatprep.subr.bf16.mxu1 %v3792_v27 }
 0x198   : > { %3497 = vmatmul.mubr.msk.bf16.vlgmr.msra.gmra.mrb[4].mxu1 %vm1097_vm7, %v4051_v47 }
 0x199   : > { %3508 = vmatprep.mubr.msk.bf16.mxu1 %vm3793_vm5, %v3792_v27 }
 0x19a   : > { %3463 = vmatpush3.bf16.msra.mxu0 %v3704_v35 }
 0x19b   : > { %3468 = vmatprep.subr.bf16.mxu0 %v3792_v27 }
 0x263   : > { %v1283_v61 = vpop.f32.mrb[0].mxu1 }
 0x264   : > { %v1284_v62 = vadd.f32 %v3228_v60, %v1283_v61  ;;  %v3482_v63 = vpop.f32.mrb[1].mxu1 }
 0x265   : > { %v1286_v0 = vpop.f32.mrb[2].mxu1 }
 0x266   : > { %v1287_v1 = vadd.f32 %v3228_v60, %v1286_v0  ;;  %v3483_v2 = vpop.f32.mrb[3].mxu1 }
 0x268   : > { %v1066_v36 = vpop.f32.mrb[0].mxu0  ;;  %v1290_v3 = vpack.c.bf16 %v1287_v1, %v1284_v62 }
 0x269   : > { %v3458_v37 = vpop.f32.mrb[1].mxu0  ;;  %v1073_v39 = vadd.f32 %v1066_v36, %v1005_v24 }
 0x26a   : > { %v1069_v38 = vpop.f32.mrb[2].mxu0 }
 0x26b   : > { %v1074_v40 = vadd.f32 %v1069_v38, %v1006_v25  ;;  %v3459_v41 = vpop.f32.mrb[3].mxu0  ;;  %v1411_v36 = vpop.f32.mrb[4].mxu1 }
 0x26c   : > { %v3498_v37 = vpop.f32.mrb[5].mxu1 }
 0x26d   : > { %v1075_v42 = vpack.c.bf16 %v1074_v40, %v1073_v39  ;;  %v1414_v38 = vpop.f32.mrb[6].mxu1  ;;  %v3244_v39 = vld [vmem:[%s3953_s23 + $0x8] ss:$0 sm:$0xff]  ;;  %v3270_v37 = vld [vmem:[%s3953_s23 + $0x9] ss:$0 sm:$0xff] }
 0x26e   : > { %v3499_v40 = vpop.f32.mrb[7].mxu1  ;;  %v1412_v41 = vadd.f32 %v3244_v39, %v1411_v36 }
 0x26f   : > { %3465 = vmatmul.mubr.msk.bf16.vlgmr.msra.gmra.mrb[4].mxu0 %vm1097_vm7, %v1075_v42  ;;  %v1415_v42 = vadd.f32 %v3244_v39, %v1414_v38 }
 0x270   : > { %3472 = vmatprep.mubr.msk.bf16.mxu0 %vm3793_vm5, %v3792_v27  ;;  %3469 = vmatpush3.bf16.msra.mxu0 %v3705_v43 }
 0x271   : > { %3470 = vmatprep.subr.bf16.mxu0 %v3792_v27  ;;  %v1418_v43 = vpack.c.bf16 %v1415_v42, %v1412_v41  ;;  %v3721_v42 = vld [vmem:[%s3963_s0 + $0x20] sm:$0xff]  }
 0x273   : > { %3507 = vmatpush3.bf16.msra.mxu1 %v1418_v43  ;;  %v3722_v43 = vld [vmem:[%s3963_s0 + $0x28] sm:$0xff]  }
 0x274   : > { %3471 = vmatpush3.bf16.msra.mxu0 %v3706_v44  ;;  %3520 = vmatprep.subr.bf16.mxu1 %v3792_v27  ;;  %v3715_v44 = vld [vmem:[%s3963_s0 + $0x10] sm:$0xff]  }
 0x275   : > { %3484 = vmatprep.subr.bf16.mxu0 %v3792_v27 }
 0x342   : > { %v1135_v49 = vpop.f32.mrb[4].mxu0 }
 0x343   : > { %v1136_v50 = vadd.f32 %v3216_v48, %v1135_v49  ;;  %v3466_v51 = vpop.f32.mrb[5].mxu0 }
 0x344   : > { %v1138_v52 = vpop.f32.mrb[6].mxu0 }
 0x345   : > { %v1139_v53 = vadd.f32 %v3216_v48, %v1138_v52  ;;  %v3467_v54 = vpop.f32.mrb[7].mxu0  ;;  %v1142_v55 = vmax.f32 %v1136_v50, 0.0 }
 0x347   : > { %v1143_v56 = vmax.f32 %v1139_v53, 0.0  ;;  %v3713_v53 = vld [vmem:[%s3963_s0 + $0x50] sm:$0xff]  }
 0x349   : > { %v1144_v58 = vpack.c.bf16 %v1143_v56, %v1142_v55  ;;  %v3714_v55 = vld [vmem:[%s3963_s0 + $0x58] sm:$0xff]   ;;  %v3254_v56 = vld [vmem:[%s3953_s23 + $0x1] ss:$0 sm:$0xff] }
 0x34b   : > { %3473 = vmatmul.mubr.msk.bf16.vlgmr.msra.gmra.mrb[8].mxu0 %vm1097_vm7, %v1144_v58 }
 0x34c   : > { %3485 = vmatpush3.bf16.msra.mxu0 %v3707_v57  ;;  %3488 = vmatprep.mubr.msk.bf16.mxu0 %vm3793_vm5, %v3792_v27 }
 0x34d   : > { %3486 = vmatprep.subr.bf16.mxu0 %v3792_v27 }
 0x350   : > { %3487 = vmatpush3.bf16.msra.mxu0 %v3708_v59 }
 0x351   : > { %3500 = vmatprep.subr.bf16.mxu0 %v3792_v27 }
 0x353   : > { %3489 = vmatmul.mubr.msk.bf16.vlgmr.msra.gmra.mrb[12].mxu0 %vm1097_vm7, %v4051_v47 }
 0x354   : > { %3502 = vmatprep.mubr.msk.bf16.mxu0 %vm3793_vm5, %v3792_v27 }
 0x41e   : > { %v4071_v4 = vpop.f32.mrb[8].mxu0 }
 0x41f   : > { %v3474_v5 = vpop.f32.mrb[9].mxu0 }
 0x420   : > { %v4073_v6 = vpop.f32.mrb[10].mxu0  ;;  %v3262_v5 = vld [vmem:[%s3953_s23 + $0x5] ss:$0 sm:$0xff] }
 0x421   : > { %v3475_v7 = vpop.f32.mrb[11].mxu0 }
 0x426   : > { %v1347_v9 = vpop.f32.mrb[12].mxu0 }
 0x427   : > { %v3490_v10 = vpop.f32.mrb[13].mxu0  ;;  %v1348_v12 = vadd.f32 %v3236_v8, %v1347_v9 }
 0x428   : > { %v1350_v11 = vpop.f32.mrb[14].mxu0 }
 0x429   : > { %v1351_v13 = vadd.f32 %v3236_v8, %v1350_v11  ;;  %v3491_v14 = vpop.f32.mrb[15].mxu0 }
 0x42b   : > { %v1354_v15 = vpack.c.bf16 %v1351_v13, %v1348_v12 }
 0x42d   : > { %v1424_v16 = vsel %vm1419_vm8, %v1354_v15, 0  ;;  %v3717_v15 = vld [vmem:[%s3963_s0 + $0x90] sm:$0xff]  }
 0x42e   : > { %3501 = vmatpush3.bf16.xpose.msra.mxu0 %v1424_v16  ;;  %v3718_v16 = vld [vmem:[%s3963_s0 + $0x98] sm:$0xff]  }
 0x42f   : > { %3512 = vmatprep.subr.bf16.mxu0 %v3792_v27 }
 0x435   : > { %3503 = vmatmul.mubr.msk.bf16.vlgmr.msra.gmra.mrb[16].mxu0 %vm1419_vm8, %v1290_v3 }
 0x436   : > { %3516 = vmatprep.mubr.msk.bf16.mxu0 %vm3793_vm5, %v3792_v27  ;;  %3513 = vmatpush3.bf16.msra.mxu0 %v3715_v44 }
 0x437   : > { %3514 = vmatprep.subr.bf16.mxu0 %v3792_v27 }
 0x43a   : > { %3515 = vmatpush3.bf16.msra.mxu0 %v3716_v45 }
 0x43b   : > { %3528 = vmatprep.subr.bf16.mxu0 %v3792_v27 }
 0x43d   : > { %3517 = vmatmul.mubr.msk.bf16.vlgmr.msra.gmra.mrb[20].mxu0 %vm1097_vm7, %v4051_v47 }
 0x43e   : > { %3532 = vmatprep.mubr.msk.bf16.mxu0 %vm3793_vm5, %v3792_v27  ;;  %3529 = vmatpush3.bf16.msra.mxu0 %v3717_v15 }
 0x43f   : > { %3530 = vmatprep.subr.bf16.mxu0 %v3792_v27 }
 0x442   : > { %3531 = vmatpush3.bf16.msra.mxu0 %v3718_v16 }
 0x443   : > { %3542 = vmatprep.subr.bf16.mxu0 %v3792_v27 }
 0x445   : > { %3533 = vmatmul.mubr.msk.bf16.vlgmr.msra.gmra.mrb[24].mxu0 %vm1097_vm7, %v4051_v47 }
 0x446   : > { %3544 = vmatprep.mubr.msk.bf16.mxu0 %vm3793_vm5, %v3792_v27 }
 0x508   : > { %v1460_v19 = vpop.f32.mrb[16].mxu0 }
 0x509   : > { %v3504_v20 = vpop.f32.mrb[17].mxu0  ;;  %v1467_v21 = vsel %vm1028_vm6, %v1460_v19, -inf }
 0x50a   : > { %1468 = vmax.xlane.f32.xlu0 %v1467_v21  ;;  %v1463_v22 = vpop.f32.mrb[18].mxu0 }
 0x50b   : > { %v3505_v23 = vpop.f32.mrb[19].mxu0  ;;  %v1470_v24 = vsel %vm1028_vm6, %v1463_v22, -inf }
 0x50e   : > { %1471 = vmax.xlane.f32.xlu0 %v1470_v24 }
 0x510   : > { %v1592_v57 = vpop.f32.mrb[20].mxu0 }
 0x511   : > { %v1593_v58 = vadd.f32 %v3254_v56, %v1592_v57  ;;  %v3518_v59 = vpop.f32.mrb[21].mxu0 }
 0x512   : > { %v1595_v60 = vpop.f32.mrb[22].mxu0 }
 0x513   : > { %v1596_v61 = vadd.f32 %v3254_v56, %v1595_v60  ;;  %v3519_v62 = vpop.f32.mrb[23].mxu0 }
 0x515   : > { %v1599_v63 = vpack.c.bf16 %v1596_v61, %v1593_v58 }
 0x597   : > { %v1469_v25 = vpop.xlane.xlu0 %1468 }
 0x598   : > { %v1473_v26 = vsub.f32 %v1460_v19, %v1469_v25 }
 0x59a   : > { %v1475_v28 = vmul.f32 1.442695, %v1473_v26 }
 0x59b   : > { %v1472_v29 = vpop.xlane.xlu0 %1471 }
 0x59c   : > { %3739 = vpow2.f32 %v1475_v28  ;;  %v1474_v30 = vsub.f32 %v1463_v22, %v1472_v29 }
 0x59e   : > { %v1477_v31 = vmul.f32 1.442695, %v1474_v30 }
 0x5a0   : > { %3741 = vpow2.f32 %v1477_v31 }
 0x5a6   : > { %v3740_v32 = vpop.eup %3739 }
 0x5a7   : > { %v1479_v33 = vsel %vm1028_vm6, %v3740_v32, 0.0 }
 0x5a8   : > { %1480 = vadd.xlane.f32.xlu1 %v1479_v33 }
 0x5aa   : > { %v3742_v34 = vpop.eup %3741 }
 0x5ab   : > { %v1482_v35 = vsel %vm1028_vm6, %v3742_v34, 0.0 }
 0x5ac   : > { %1483 = vadd.xlane.f32.xlu1 %v1482_v35 }
 0x635   : > { %v1481_v46 = vpop.xlane.xlu1 %1480 }
 0x636   : > { %3743 = vrcp.f32 %v1481_v46 }
 0x639   : > { %v1484_v48 = vpop.xlane.xlu1 %1483 }
 0x63a   : > { %3745 = vrcp.f32 %v1484_v48 }
 0x640   : > { %v3744_v49 = vpop.eup %3743 }
 0x641   : > { %v1487_v51 = vmul.f32 %v3744_v49, %v3740_v32 }
 0x644   : > { %v3746_v50 = vpop.eup %3745 }
 0x645   : > { %v1488_v52 = vmul.f32 %v3746_v50, %v3742_v34  ;;  %v1720_v34 = vpop.f32.mrb[24].mxu0 }
 0x646   : > { %v3534_v35 = vpop.f32.mrb[25].mxu0  ;;  %v1721_v39 = vadd.f32 %v3270_v37, %v1720_v34 }
 0x647   : > { %v1489_v54 = vpack.c.bf16 %v1488_v52, %v1487_v51  ;;  %v1723_v36 = vpop.f32.mrb[26].mxu0  ;;  %v3719_v51 = vld [vmem:[%s3963_s0 + $0x60] sm:$0xff]   ;;  %v3296_v35 = vld [vmem:[%s3953_s23 + $0xa] ss:$0 sm:$0xff] }
 0x648   : > { %v3535_v38 = vpop.f32.mrb[27].mxu0  ;;  %v1724_v40 = vadd.f32 %v3270_v37, %v1723_v36 }
 0x649   : > { %3509 = vmatmul.mubr.msk.bf16.vlgmr.msra.gmra.mrb[8].mxu1 %vm1028_vm6, %v1489_v54  ;;  %v3280_v54 = vld [vmem:[%s3953_s23 + $0x2] ss:$0 sm:$0xff] }
 0x64a   : > { %3521 = vmatpush3.bf16.msra.mxu1 %v3713_v53  ;;  %3524 = vmatprep.mubr.msk.bf16.mxu1 %vm3793_vm5, %v3792_v27  ;;  %v1727_v41 = vpack.c.bf16 %v1724_v40, %v1721_v39  ;;  %v3720_v53 = vld [vmem:[%s3963_s0 + $0x68] sm:$0xff]   ;;  %v3727_v40 = vld [vmem:[%s3963_s0 + $0x30] sm:$0xff]  }
 0x64b   : > { %3522 = vmatprep.subr.bf16.mxu1 %v3792_v27 }
 0x64c   : > { %3543 = vmatpush3.bf16.msra.mxu0 %v1727_v41  ;;  %v3728_v41 = vld [vmem:[%s3963_s0 + $0x38] sm:$0xff]  }
 0x64d   : > { %3556 = vmatprep.subr.bf16.mxu0 %v3792_v27 }
 0x64e   : > { %3523 = vmatpush3.bf16.msra.mxu1 %v3714_v55 }
 0x64f   : > { %3536 = vmatprep.subr.bf16.mxu1 %v3792_v27 }
 0x651   : > { %3525 = vmatmul.mubr.msk.bf16.vlgmr.msra.gmra.mrb[12].mxu1 %vm1097_vm7, %v4051_v47 }
 0x652   : > { %3538 = vmatprep.mubr.msk.bf16.mxu1 %vm3793_vm5, %v3792_v27 }
 0x71c   : > { %v1527_v0 = vpop.f32.mrb[8].mxu1 }
 0x71d   : > { %1534 = vst.msk [vmem:[#allocation3] sm:$0xff] %vm1419_vm8, %v1527_v0  ;;  %v3510_v1 = vpop.f32.mrb[9].mxu1 }
 0x71e   : > { %v1530_v2 = vpop.f32.mrb[10].mxu1 }
 0x71f   : > { %1535 = vst.msk [vmem:[#allocation3 + $0x8] sm:$0xff] %vm1419_vm8, %v1530_v2  ;;  %v3511_v3 = vpop.f32.mrb[11].mxu1  ;;  %v3288_v2 = vld [vmem:[%s3953_s23 + $0x6] ss:$0 sm:$0xff] }
 0x724   : > { %v1656_v7 = vpop.f32.mrb[12].mxu1 }
 0x725   : > { %v3526_v8 = vpop.f32.mrb[13].mxu1  ;;  %v1657_v10 = vadd.f32 %v3262_v5, %v1656_v7 }
 0x726   : > { %v1659_v9 = vpop.f32.mrb[14].mxu1 }
 0x727   : > { %v1660_v11 = vadd.f32 %v3262_v5, %v1659_v9  ;;  %v3527_v12 = vpop.f32.mrb[15].mxu1 }
 0x729   : > { %v1663_v13 = vpack.c.bf16 %v1660_v11, %v1657_v10 }
 0x72b   : > { %v1732_v14 = vsel %vm1419_vm8, %v1663_v13, 0  ;;  %v3723_v13 = vld [vmem:[%s3963_s0 + $0xa0] sm:$0xff]  }
 0x72c   : > { %3537 = vmatpush3.bf16.xpose.msra.mxu1 %v1732_v14  ;;  %v3724_v14 = vld [vmem:[%s3963_s0 + $0xa8] sm:$0xff]  }
 0x72d   : > { %3548 = vmatprep.subr.bf16.mxu1 %v3792_v27 }
 0x733   : > { %3539 = vmatmul.mubr.msk.bf16.vlgmr.msra.gmra.mrb[16].mxu1 %vm1419_vm8, %v1599_v63 }
 0x734   : > { %3552 = vmatprep.mubr.msk.bf16.mxu1 %vm3793_vm5, %v3792_v27  ;;  %3549 = vmatpush3.bf16.msra.mxu1 %v3721_v42 }
 0x735   : > { %3550 = vmatprep.subr.bf16.mxu1 %v3792_v27 }
 0x738   : > { %3551 = vmatpush3.bf16.msra.mxu1 %v3722_v43 }
 0x739   : > { %3564 = vmatprep.subr.bf16.mxu1 %v3792_v27 }
 0x73b   : > { %3553 = vmatmul.mubr.msk.bf16.vlgmr.msra.gmra.mrb[20].mxu1 %vm1097_vm7, %v4051_v47 }
 0x73c   : > { %3568 = vmatprep.mubr.msk.bf16.mxu1 %vm3793_vm5, %v3792_v27  ;;  %3565 = vmatpush3.bf16.msra.mxu1 %v3723_v13  ;;  %v3729_v13 = vld [vmem:[%s3963_s0 + $0xb0] sm:$0xff]  }
 0x73d   : > { %3566 = vmatprep.subr.bf16.mxu1 %v3792_v27 }
 0x740   : > { %3567 = vmatpush3.bf16.msra.mxu1 %v3724_v14  ;;  %v3730_v14 = vld [vmem:[%s3963_s0 + $0xb8] sm:$0xff]  }
 0x741   : > { %3578 = vmatprep.subr.bf16.mxu1 %v3792_v27 }
 0x743   : > { %3569 = vmatmul.mubr.msk.bf16.vlgmr.msra.gmra.mrb[24].mxu1 %vm1097_vm7, %v4051_v47 }
 0x744   : > { %3580 = vmatprep.mubr.msk.bf16.mxu1 %vm3793_vm5, %v3792_v27 }
 0x806   : > { %v1768_v17 = vpop.f32.mrb[16].mxu1 }
 0x807   : > { %v3540_v18 = vpop.f32.mrb[17].mxu1  ;;  %v1775_v19 = vsel %vm1028_vm6, %v1768_v17, -inf }
 0x808   : > { %1776 = vmax.xlane.f32.xlu0 %v1775_v19  ;;  %v1771_v20 = vpop.f32.mrb[18].mxu1 }
 0x809   : > { %v3541_v21 = vpop.f32.mrb[19].mxu1  ;;  %v1778_v22 = vsel %vm1028_vm6, %v1771_v20, -inf }
 0x80a   : > { %1779 = vmax.xlane.f32.xlu1 %v1778_v22 }
 0x80e   : > { %v1909_v55 = vpop.f32.mrb[20].mxu1 }
 0x80f   : > { %v1910_v56 = vadd.f32 %v3280_v54, %v1909_v55  ;;  %v3554_v57 = vpop.f32.mrb[21].mxu1 }
 0x810   : > { %v1912_v58 = vpop.f32.mrb[22].mxu1 }
 0x811   : > { %v1913_v59 = vadd.f32 %v3280_v54, %v1912_v58  ;;  %v3555_v60 = vpop.f32.mrb[23].mxu1 }
 0x813   : > { %v1916_v61 = vpack.c.bf16 %v1913_v59, %v1910_v56 }
 0x895   : > { %v1777_v23 = vpop.xlane.xlu0 %1776 }
 0x896   : > { %v1781_v24 = vsub.f32 %v1768_v17, %v1777_v23 }
 0x897   : > { %v1780_v25 = vpop.xlane.xlu1 %1779 }
 0x898   : > { %v1783_v26 = vmul.f32 1.442695, %v1781_v24  ;;  %v1782_v28 = vsub.f32 %v1771_v20, %v1780_v25 }
 0x89a   : > { %3747 = vpow2.f32 %v1783_v26  ;;  %v1785_v29 = vmul.f32 1.442695, %v1782_v28 }
 0x89c   : > { %3749 = vpow2.f32 %v1785_v29 }
 0x8a4   : > { %v3748_v30 = vpop.eup %3747 }
 0x8a5   : > { %v1787_v31 = vsel %vm1028_vm6, %v3748_v30, 0.0 }
 0x8a6   : > { %v3750_v32 = vpop.eup %3749  ;;  %1788 = vadd.xlane.f32.xlu0 %v1787_v31 }
 0x8a7   : > { %v1790_v33 = vsel %vm1028_vm6, %v3750_v32, 0.0 }
 0x8a8   : > { %1791 = vadd.xlane.f32.xlu1 %v1790_v33 }
 0x933   : > { %v1789_v44 = vpop.xlane.xlu0 %1788 }
 0x934   : > { %3751 = vrcp.f32 %v1789_v44 }
 0x935   : > { %v1792_v45 = vpop.xlane.xlu1 %1791 }
 0x936   : > { %3753 = vrcp.f32 %v1792_v45 }
 0x93e   : > { %v3752_v46 = vpop.eup %3751 }
 0x93f   : > { %v1795_v49 = vmul.f32 %v3752_v46, %v3748_v30 }
 0x940   : > { %v3754_v48 = vpop.eup %3753 }
 0x941   : > { %v1796_v50 = vmul.f32 %v3754_v48, %v3750_v32  ;;  %v2037_v32 = vpop.f32.mrb[24].mxu1 }
 0x942   : > { %v3570_v33 = vpop.f32.mrb[25].mxu1  ;;  %v2038_v37 = vadd.f32 %v3296_v35, %v2037_v32 }
 0x943   : > { %v1797_v52 = vpack.c.bf16 %v1796_v50, %v1795_v49  ;;  %v2040_v34 = vpop.f32.mrb[26].mxu1  ;;  %v3725_v49 = vld [vmem:[%s3963_s0 + $0x70] sm:$0xff]  }
 0x944   : > { %v3571_v36 = vpop.f32.mrb[27].mxu1  ;;  %v2041_v38 = vadd.f32 %v3296_v35, %v2040_v34  ;;  %v3322_v34 = vld [vmem:[%s3953_s23 + $0xb] ss:$0 sm:$0xff] }
 0x945   : > { %3545 = vmatmul.mubr.msk.bf16.vlgmr.msra.gmra.mrb[28].mxu0 %vm1028_vm6, %v1797_v52  ;;  %v3306_v52 = vld [vmem:[%s3953_s23 + $0x3] ss:$0 sm:$0xff] }
 0x946   : > { %3557 = vmatpush3.bf16.msra.mxu0 %v3719_v51  ;;  %3560 = vmatprep.mubr.msk.bf16.mxu0 %vm3793_vm5, %v3792_v27  ;;  %v2044_v39 = vpack.c.bf16 %v2041_v38, %v2038_v37  ;;  %v3726_v51 = vld [vmem:[%s3963_s0 + $0x78] sm:$0xff]   ;;  %s3795_s0 = smov 16  }
 0x947   : > { %3558 = vmatprep.subr.bf16.mxu0 %v3792_v27 }
 0x948   : > { %3579 = vmatpush3.bf16.msra.mxu1 %v2044_v39 }
 0x949   : > { %3592 = vmatprep.subr.bf16.mxu1 %v3792_v27 }
 0x94a   : > { %3559 = vmatpush3.bf16.msra.mxu0 %v3720_v53 }
 0x94b   : > { %3572 = vmatprep.subr.bf16.mxu0 %v3792_v27 }
 0x94d   : > { %3561 = vmatmul.mubr.msk.bf16.vlgmr.msra.gmra.mrb[32].mxu0 %vm1097_vm7, %v4051_v47 }
 0x94e   : > { %3574 = vmatprep.mubr.msk.bf16.mxu0 %vm3793_vm5, %v3792_v27 }
 0xa18   : > { %v4157_v62 = vpop.f32.mrb[28].mxu0 }
 0xa19   : > { %v3546_v63 = vpop.f32.mrb[29].mxu0 }
 0xa1a   : > { %v4159_v0 = vpop.f32.mrb[30].mxu0 }
 0xa1b   : > { %v3547_v1 = vpop.f32.mrb[31].mxu0 }
 0xa20   : > { %v1973_v3 = vpop.f32.mrb[32].mxu0 }
 0xa21   : > { %v3562_v5 = vpop.f32.mrb[33].mxu0  ;;  %v1974_v8 = vadd.f32 %v3288_v2, %v1973_v3 }
 0xa22   : > { %v1976_v7 = vpop.f32.mrb[34].mxu0 }
 0xa23   : > { %v1977_v9 = vadd.f32 %v3288_v2, %v1976_v7  ;;  %v3563_v10 = vpop.f32.mrb[35].mxu0  ;;  %v3314_v2 = vld [vmem:[%s3953_s23 + $0x7] ss:$0 sm:$0xff]  ;;  %s3796_s23 = smov 24  }
 0xa25   : > { %v1980_v11 = vpack.c.bf16 %v1977_v9, %v1974_v8 }
 0xa27   : > { %v2049_v12 = vsel %vm1419_vm8, %v1980_v11, 0 }
 0xa28   : > { %3573 = vmatpush3.bf16.xpose.msra.mxu0 %v2049_v12 }
 0xa29   : > { %3584 = vmatprep.subr.bf16.mxu0 %v3792_v27 }
 0xa2f   : > { %3575 = vmatmul.mubr.msk.bf16.vlgmr.msra.gmra.mrb[36].mxu0 %vm1419_vm8, %v1916_v61 }
 0xa30   : > { %3588 = vmatprep.mubr.msk.bf16.mxu0 %vm3793_vm5, %v3792_v27  ;;  %3585 = vmatpush3.bf16.msra.mxu0 %v3727_v40 }
 0xa31   : > { %3586 = vmatprep.subr.bf16.mxu0 %v3792_v27 }
 0xa34   : > { %3587 = vmatpush3.bf16.msra.mxu0 %v3728_v41 }
 0xa35   : > { %3600 = vmatprep.subr.bf16.mxu0 %v3792_v27 }
 0xa37   : > { %3589 = vmatmul.mubr.msk.bf16.vlgmr.msra.gmra.mrb[40].mxu0 %vm1097_vm7, %v4051_v47 }
 0xa38   : > { %3604 = vmatprep.mubr.msk.bf16.mxu0 %vm3793_vm5, %v3792_v27  ;;  %3601 = vmatpush3.bf16.msra.mxu0 %v3729_v13  ;;  %v3328_v13 = vld [vmem:[%s4388_s1] ss:$0 sm:$0xff] }
 0xa39   : > { %3602 = vmatprep.subr.bf16.mxu0 %v3792_v27 }
 0xa3c   : > { %3603 = vmatpush3.bf16.msra.mxu0 %v3730_v14  ;;  %v3771_v14 = vld [vmem:[#allocation2] sm:$0xff] }
 0xa3d   : > { %3614 = vmatprep.subr.bf16.mxu0 %v3792_v27 }
 0xa3f   : > { %3605 = vmatmul.mubr.msk.bf16.vlgmr.msra.gmra.mrb[44].mxu0 %vm1097_vm7, %v4051_v47 }
 0xa40   : > { %3616 = vmatprep.mubr.msk.bf16.mxu0 %vm3793_vm5, %v3792_v27 }
 0xb02   : > { %v2085_v15 = vpop.f32.mrb[36].mxu0 }
 0xb03   : > { %v3576_v16 = vpop.f32.mrb[37].mxu0  ;;  %v2092_v17 = vsel %vm1028_vm6, %v2085_v15, -inf }
 0xb04   : > { %2093 = vmax.xlane.f32.xlu0 %v2092_v17  ;;  %v2088_v18 = vpop.f32.mrb[38].mxu0 }
 0xb05   : > { %v3577_v19 = vpop.f32.mrb[39].mxu0  ;;  %v2095_v20 = vsel %vm1028_vm6, %v2088_v18, -inf }
 0xb06   : > { %2096 = vmax.xlane.f32.xlu1 %v2095_v20 }
 0xb0a   : > { %v2226_v53 = vpop.f32.mrb[40].mxu0 }
 0xb0b   : > { %v2227_v54 = vadd.f32 %v3306_v52, %v2226_v53  ;;  %v3590_v55 = vpop.f32.mrb[41].mxu0 }
 0xb0c   : > { %v2229_v56 = vpop.f32.mrb[42].mxu0 }
 0xb0d   : > { %v2230_v57 = vadd.f32 %v3306_v52, %v2229_v56  ;;  %v3591_v58 = vpop.f32.mrb[43].mxu0 }
 0xb0f   : > { %v2233_v59 = vpack.c.bf16 %v2230_v57, %v2227_v54 }
 0xb91   : > { %v2094_v21 = vpop.xlane.xlu0 %2093 }
 0xb92   : > { %v2098_v22 = vsub.f32 %v2085_v15, %v2094_v21 }
 0xb93   : > { %v2097_v23 = vpop.xlane.xlu1 %2096 }
 0xb94   : > { %v2100_v24 = vmul.f32 1.442695, %v2098_v22  ;;  %v2099_v25 = vsub.f32 %v2088_v18, %v2097_v23 }
 0xb96   : > { %3755 = vpow2.f32 %v2100_v24  ;;  %v2102_v26 = vmul.f32 1.442695, %v2099_v25 }
 0xb98   : > { %3757 = vpow2.f32 %v2102_v26 }
 0xba0   : > { %v3756_v28 = vpop.eup %3755 }
 0xba1   : > { %v2104_v29 = vsel %vm1028_vm6, %v3756_v28, 0.0 }
 0xba2   : > { %v3758_v30 = vpop.eup %3757  ;;  %2105 = vadd.xlane.f32.xlu0 %v2104_v29 }
 0xba3   : > { %v2107_v31 = vsel %vm1028_vm6, %v3758_v30, 0.0 }
 0xba4   : > { %2108 = vadd.xlane.f32.xlu1 %v2107_v31  ;;  %v2354_v31 = vpop.f32.mrb[44].mxu0 }
 0xba5   : > { %v3606_v32 = vpop.f32.mrb[45].mxu0  ;;  %v2355_v36 = vadd.f32 %v3322_v34, %v2354_v31 }
 0xba6   : > { %v2357_v33 = vpop.f32.mrb[46].mxu0 }
 0xba7   : > { %v3607_v35 = vpop.f32.mrb[47].mxu0  ;;  %v2358_v37 = vadd.f32 %v3322_v34, %v2357_v33 }
 0xba9   : > { %v2361_v38 = vpack.c.bf16 %v2358_v37, %v2355_v36 }
 0xbab   : > { %3615 = vmatpush3.bf16.msra.mxu0 %v2361_v38 }
 0xbac   : > { %3628 = vmatprep.subr.bf16.mxu0 %v3792_v27 }
 0xc2f   : > { %v2106_v42 = vpop.xlane.xlu0 %2105 }
 0xc30   : > { %3759 = vrcp.f32 %v2106_v42 }
 0xc31   : > { %v2109_v43 = vpop.xlane.xlu1 %2108 }
 0xc32   : > { %3761 = vrcp.f32 %v2109_v43 }
 0xc3a   : > { %v3760_v44 = vpop.eup %3759 }
 0xc3b   : > { %v2112_v46 = vmul.f32 %v3760_v44, %v3756_v28 }
 0xc3c   : > { %v3762_v45 = vpop.eup %3761 }
 0xc3d   : > { %v2113_v48 = vmul.f32 %v3762_v45, %v3758_v30 }
 0xc3f   : > { %v2114_v50 = vpack.c.bf16 %v2113_v48, %v2112_v46 }
 0xc41   : > { %3581 = vmatmul.mubr.msk.bf16.vlgmr.msra.gmra.mrb[28].mxu1 %vm1028_vm6, %v2114_v50  ;;  %v3732_v50 = vld [vmem:[%s3958_s19 + $0x8] sm:$0xff]  }
 0xc42   : > { %3593 = vmatpush3.bf16.msra.mxu1 %v3725_v49  ;;  %3596 = vmatprep.mubr.msk.bf16.mxu1 %vm3793_vm5, %v3792_v27  ;;  %v3731_v49 = vld [vmem:[%s3958_s19] sm:$0xff]  }
 0xc43   : > { %3594 = vmatprep.subr.bf16.mxu1 %v3792_v27 }
 0xc46   : > { %3595 = vmatpush3.bf16.msra.mxu1 %v3726_v51 }
 0xc47   : > { %3608 = vmatprep.subr.bf16.mxu1 %v3792_v27 }
 0xc49   : > { %3597 = vmatmul.mubr.msk.bf16.vlgmr.msra.gmra.mrb[32].mxu1 %vm1097_vm7, %v4051_v47 }
 0xc4a   : > { %3610 = vmatprep.mubr.msk.bf16.mxu1 %vm3793_vm5, %v3792_v27 }
 0xd14   : > { %v2152_v60 = vpop.f32.mrb[28].mxu1 }
 0xd15   : > { %v3582_v61 = vpop.f32.mrb[29].mxu1 }
 0xd16   : > { %v2155_v63 = vpop.f32.mrb[30].mxu1  ;;  %v3734_v61 = vld [vmem:[%s3972_s24 + $0x8] sm:$0xff]  }
 0xd17   : > { %v3583_v1 = vpop.f32.mrb[31].mxu1 }
 0xd18   : > { %v3736_v1 = vld [vmem:[%s3981_s18 + $0x8] sm:$0xff]  }
 0xd1c   : > { %v2290_v3 = vpop.f32.mrb[32].mxu1 }
 0xd1d   : > { %v3598_v5 = vpop.f32.mrb[33].mxu1  ;;  %v2291_v8 = vadd.f32 %v3314_v2, %v2290_v3 }
 0xd1e   : > { %v2293_v7 = vpop.f32.mrb[34].mxu1  ;;  %v3224_v5 = vld [vmem:[%s3946_s8 + $0x1] ss:$0 sm:$0xff]  ;;  %s4391_s8 = sld [smem:[#allocation17_spill]] (!%p3342_p5) }
 0xd1f   : > { %v2294_v9 = vadd.f32 %v3314_v2, %v2293_v7  ;;  %v3599_v10 = vpop.f32.mrb[35].mxu1  ;;  %v1213_v2 = vlaneseq  ;;  %v1205_v7 = vadd.f32 %v3224_v5, %v4071_v4 }
 0xd20   : > { %v1208_v10 = vadd.f32 %v3224_v5, %v4073_v6 }
 0xd21   : > { %v2297_v11 = vpack.c.bf16 %v2294_v9, %v2291_v8  ;;  %v4240_v3 = vshrl.u32 %v1213_v2, 7  ;;  %v1008_v9 = vld [vmem:[%s3991_s20] sm:$0x3f] }
 0xd23   : > { %v2366_v12 = vsel %vm1419_vm8, %v2297_v11, 0  ;;  %v1215_v8 = vsub.s32 0, %v4240_v3  ;;  %v2561_v11 = vsub.s32 2, %v4240_v3 }
 0xd24   : > { %3609 = vmatpush3.bf16.xpose.msra.mxu1 %v2366_v12  ;;  %v1221_v12 = vsub.s32 1, %v4240_v3 }
 0xd25   : > { %3620 = vmatprep.subr.bf16.mxu1 %v3792_v27 }
 0xd2b   : > { %3611 = vmatmul.mubr.msk.bf16.vlgmr.msra.gmra.mrb[36].mxu1 %vm1419_vm8, %v2233_v59 }
 0xd2c   : > { %3624 = vmatprep.mubr.msk.bf16.mxu1 %vm3793_vm5, %v3792_v27  ;;  %3621 = vmatpush3.bf16.msra.mxu1 %v3731_v49 }
 0xd2d   : > { %3622 = vmatprep.subr.bf16.mxu1 %v3792_v27 }
 0xd30   : > { %3623 = vmatpush3.bf16.msra.mxu1 %v3732_v50 }
 0xd31   : > { %3636 = vmatprep.subr.bf16.mxu1 %v3792_v27 }
 0xdfe   : > { %v2402_v15 = vpop.f32.mrb[36].mxu1 }
 0xdff   : > { %v3612_v16 = vpop.f32.mrb[37].mxu1  ;;  %v2409_v17 = vsel %vm1028_vm6, %v2402_v15, -inf }
 0xe00   : > { %2410 = vmax.xlane.f32.xlu0 %v2409_v17  ;;  %v2405_v18 = vpop.f32.mrb[38].mxu1  ;;  %v1216_v16 = vrot.slane %v1008_v9, %v1215_v8  ;;  %v2567_v17 = vsub.s32 3, %v4240_v3 }
 0xe01   : > { %v3613_v19 = vpop.f32.mrb[39].mxu1  ;;  %v2412_v20 = vsel %vm1028_vm6, %v2405_v18, -inf }
 0xe02   : > { %2413 = vmax.xlane.f32.xlu1 %v2412_v20 }
 0xe8d   : > { %v2411_v21 = vpop.xlane.xlu0 %2410 }
 0xe8e   : > { %v2415_v22 = vsub.f32 %v2402_v15, %v2411_v21  ;;  %v1211_v15 = vadd.f32 %v3771_v14, %v1205_v7  ;;  %v2562_v21 = vrot.slane %v1008_v9, %v2561_v11 }
 0xe8f   : > { %v2414_v23 = vpop.xlane.xlu1 %2413 }
 0xe90   : > { %v2417_v24 = vmul.f32 1.442695, %v2415_v22  ;;  %v2416_v25 = vsub.f32 %v2405_v18, %v2414_v23  ;;  %v3772_v18 = vld [vmem:[#allocation2 + $0x8] sm:$0xff]  ;;  %v1222_v22 = vrot.slane %v1008_v9, %v1221_v12 }
 0xe91   : > { %v1212_v19 = vadd.f32 %v3772_v18, %v1208_v10 }
 0xe92   : > { %3763 = vpow2.f32 %v2417_v24  ;;  %v2419_v47 = vmul.f32 1.442695, %v2416_v25  ;;  %v1217_v24 = vmul.f32 %v1216_v16, %v1211_v15 }
 0xe94   : > { %3765 = vpow2.f32 %v2419_v47  ;;  %v2568_v47 = vrot.slane %v1008_v9, %v2567_v17  ;;  %v1223_v32 = vadd.f32 %v1222_v22, %v1217_v24 }
 0xe9c   : > { %v3764_v26 = vpop.eup %3763 }
 0xe9d   : > { %v2421_v28 = vsel %vm1028_vm6, %v3764_v26, 0.0 }
 0xe9e   : > { %v3766_v29 = vpop.eup %3765  ;;  %2422 = vadd.xlane.f32.xlu0 %v2421_v28 }
 0xe9f   : > { %v2424_v30 = vsel %vm1028_vm6, %v3766_v29, 0.0 }
 0xea0   : > { %2425 = vadd.xlane.f32.xlu1 %v2424_v30 }
 0xeb1   : > { %1846 = vrot.lane.b32.xlu1 %v4159_v0, %s3794_s7 }
 0xeb4   : > { %1844 = vrot.lane.b32.xlu0 %v4157_v62, %s3794_s7 }
 0xeb5   : > { %2161 = vrot.lane.b32.xlu1 %v2152_v60, %s3795_s0  ;;  %v3733_v60 = vld [vmem:[%s3972_s24] sm:$0xff]  }
 0xeb9   : > { %2163 = vrot.lane.b32.xlu1 %v2155_v63, %s3795_s0  ;;  %v3735_v63 = vld [vmem:[%s3981_s18] sm:$0xff]   ;;  %s4390_s0 = sld [smem:[#allocation18_spill]] (!%p3342_p5) }
 0xf2b   : > { %v2423_v39 = vpop.xlane.xlu0 %2422 }
 0xf2c   : > { %3767 = vrcp.f32 %v2423_v39 }
 0xf2d   : > { %v2426_v40 = vpop.xlane.xlu1 %2425 }
 0xf2e   : > { %3769 = vrcp.f32 %v2426_v40  ;;  %v3737_v40 = vld [vmem:[%s3981_s18 + $0x10] sm:$0xff]  }
 0xf2f   : > { %v1845_v0 = vpop.permute.xlu0 %1844 }
 0xf30   : > { %1851 = vst.msk [vmem:[#allocation3] sm:$0xff] %vm1850_vm9, %v1845_v0  ;;  %v3738_v0 = vld [vmem:[%s3981_s18 + $0x18] sm:$0xff]  }
 0xf31   : > { %v1847_v41 = vpop.permute.xlu1 %1846 }
 0xf32   : > { %1852 = vst.msk [vmem:[#allocation3 + $0x8] sm:$0xff] %vm1850_vm9, %v1847_v41  ;;  %v3332_v41 = vld [vmem:[%s886_s21] ss:$0 sm:$0xff] }
 0xf35   : > { %v2162_v62 = vpop.permute.xlu1 %2161 }
 0xf36   : > { %v3768_v42 = vpop.eup %3767  ;;  %2168 = vst.msk [vmem:[#allocation3] sm:$0xff] %vm2167_vm10, %v2162_v62 }
 0xf37   : > { %v2429_v44 = vmul.f32 %v3768_v42, %v3764_v26 }
 0xf38   : > { %v3770_v43 = vpop.eup %3769 }
 0xf39   : > { %v2430_v45 = vmul.f32 %v3770_v43, %v3766_v29  ;;  %v2164_v46 = vpop.permute.xlu1 %2163  ;;  %v1218_v29 = vmul.f32 %v1216_v16, %v1212_v19  ;;  %v3343_v16 = vld [vmem:[%s4391_s8] ss:$0 sm:$0xff] (!%p3342_p5) }
 0xf3a   : > { %2169 = vst.msk [vmem:[#allocation3 + $0x8] sm:$0xff] %vm2167_vm10, %v2164_v46 }
 0xf3b   : > { %v2431_v48 = vpack.c.bf16 %v2430_v45, %v2429_v44  ;;  %v1224_v35 = vadd.f32 %v1222_v22, %v1218_v29  ;;  %v3346_v22 = vld [vmem:[%s4393_s28] ss:$0 sm:$0xff] (!%p3342_p5) }
 0xf3c   : > { %v3349_v29 = vld [vmem:[%s4394_s2] ss:$0 sm:$0xff] (!%p3342_p5) }
 0xf3d   : > { %3617 = vmatmul.mubr.msk.bf16.vlgmr.msra.gmra.mrb[48].mxu0 %vm1028_vm6, %v2431_v48 }
 0xf3e   : > { %3632 = vmatprep.mubr.msk.bf16.mxu0 %vm3793_vm5, %v3792_v27  ;;  %3629 = vmatpush3.bf16.msra.mxu0 %v3733_v60 }
 0xf3f   : > { %3630 = vmatprep.subr.bf16.mxu0 %v3792_v27 }
 0xf42   : > { %3631 = vmatpush3.bf16.msra.mxu0 %v3734_v61 }
0x1010   : > { %v2469_v51 = vpop.f32.mrb[48].mxu0 }
0x1011   : > { %2478 = vrot.lane.b32.xlu0 %v2469_v51, %s3796_s23  ;;  %v3618_v52 = vpop.f32.mrb[49].mxu0  ;;  %v3336_v51 = vld [vmem:[%s894_s29] ss:$0 sm:$0xff]  ;;  %s4389_s29 = sld [smem:[#allocation16_spill]] (!%p3342_p5) }
0x1012   : > { %v2472_v53 = vpop.f32.mrb[50].mxu0  ;;  %v2738_v52 = vsub.s32 5, %v4240_v3 }
0x1013   : > { %2480 = vrot.lane.b32.xlu1 %v2472_v53, %s3796_s23  ;;  %v3619_v54 = vpop.f32.mrb[51].mxu0 }
0x1017   : > { %v2749_v8 = vld [vmem:[%s4389_s29 + $0x8] sm:$0xff] (!%p3342_p5)  ;;  %v2751_v11 = vld [vmem:[%s4389_s29 + $0x18] sm:$0xff] (!%p3342_p5) }
0x1083   : > { %v2479_v55 = vpop.permute.xlu0 %2478 }
0x1084   : > { %2485 = vst.msk [vmem:[#allocation3] sm:$0xff] %vm2484_vm11, %v2479_v55 }
0x1085   : > { %v2481_v56 = vpop.permute.xlu1 %2480 }
0x1086   : > { %2486 = vst.msk [vmem:[#allocation3 + $0x8] sm:$0xff] %vm2484_vm11, %v2481_v56 }
0x108b   : > { %v2487_v57 = vld [vmem:[#allocation3] sm:$0xff] }
0x108d   : > { %v2488_v58 = vld [vmem:[#allocation3 + $0x8] sm:$0xff] }
0x108e   : > { %v2489_v59 = vpack.c.bf16 %v2488_v58, %v2487_v57 }
0x1090   : > { %3625 = vmatmul.mubr.msk.bf16.vlgmr.msra.gmra.mrb[40].mxu1 %vm1097_vm7, %v2489_v59  ;;  %v2739_v59 = vrot.slane %v1008_v9, %v2738_v52 }
0x1091   : > { %3644 = vmatprep.mubr.msk.bf16.mxu1 %vm3793_vm5, %v3792_v27  ;;  %3637 = vmatpush3.bf16.msra.mxu1 %v3735_v63 }
0x1092   : > { %3638 = vmatprep.subr.bf16.mxu1 %v3792_v27 }
0x1095   : > { %3639 = vmatpush3.bf16.msra.mxu1 %v3736_v1 }
0x1096   : > { %3640 = vmatprep.subr.bf16.mxu1 %v3792_v27 }
0x1099   : > { %3641 = vmatpush3.bf16.msra.mxu1 %v3737_v40 }
0x109a   : > { %3642 = vmatprep.subr.bf16.mxu1 %v3792_v27  ;;  %v2732_v27 = vsub.s32 4, %v4240_v3  ;;  %v2748_v3 = vld [vmem:[%s4389_s29] sm:$0xff] (!%p3342_p5) }
0x109b   : > { %v3671_v10 = vpack.c.bf16 (!%p3342_p5), %v2749_v8, %v2748_v3 }
0x109c   : > { %v2733_v55 = vrot.slane %v1008_v9, %v2732_v27  ;;  %v2750_v9 = vld [vmem:[%s4389_s29 + $0x10] sm:$0xff] (!%p3342_p5) }
0x109d   : > { %3643 = vmatpush3.bf16.msra.mxu1 %v3738_v0  ;;  %v3675_v12 = vpack.c.bf16 (!%p3342_p5), %v2751_v11, %v2750_v9  ;;  %3672 = vmatprep.subr.bf16.mxu0 (!%p3342_p5), %v3671_v10 }
0x1163   : > { %v2550_v4 = vpop.f32.mrb[40].mxu1 }
0x1164   : > { %v2551_v20 = vadd.f32 %v3328_v13, %v2550_v4  ;;  %v3626_v6 = vpop.f32.mrb[41].mxu1 }
0x1165   : > { %v2553_v23 = vpop.f32.mrb[42].mxu1  ;;  %v2934_v6 = vld [vmem:[%s4392_s11] sm:$0xff] (!%p3342_p5) }
0x1166   : > { %v2557_v25 = vadd.f32 %v3771_v14, %v2551_v20  ;;  %v2554_v26 = vadd.f32 %v3328_v13, %v2553_v23  ;;  %v3627_v28 = vpop.f32.mrb[43].mxu1  ;;  %v2842_v13 = vld [vmem:[%s4390_s0] sm:$0xff] (!%p3342_p5)  ;;  %v2843_v14 = vld [vmem:[%s4390_s0 + $0x8] sm:$0xff] (!%p3342_p5) }
0x1167   : > { %v3679_v15 = vpack.c.bf16 (!%p3342_p5), %v2843_v14, %v2842_v13 }
0x1168   : > { %v2563_v30 = vmul.f32 %v2562_v21, %v2557_v25  ;;  %v2558_v31 = vadd.f32 %v3772_v18, %v2554_v26 }
0x1169   : > { %3680 = vmatprep.subr.bf16.mxu1 (!%p3342_p5), %v3679_v15 }
0x116a   : > { %v2569_v33 = vadd.f32 %v2568_v47, %v2563_v30  ;;  %v2564_v34 = vmul.f32 %v2562_v21, %v2558_v31 }
0x116c   : > { %v2571_v36 = vadd.f32 %v2569_v33, %v1223_v32  ;;  %v2570_v37 = vadd.f32 %v2568_v47, %v2564_v34 }
0x116e   : > { %v2572_v38 = vadd.f32 %v2570_v37, %v1224_v35 }
0x1170   : > { %v2573_v39 = vpack.c.bf16 %v2572_v38, %v2571_v36 }
0x1172   : > { %3633 = vmatmul.mubr.msk.bf16.vlgmr.msra.gmra.mrb[52].mxu0 %vm1097_vm7, %v2573_v39 }
0x1173   : > { %3674 = vmatpush3.bf16.msra.mxu0 (!%p3342_p5), %v3671_v10 }
0x1174   : > { %3676 = vmatprep.subr.bf16.mxu0 (!%p3342_p5), %v3675_v12 }
0x1177   : > { %3678 = vmatpush3.bf16.msra.mxu0 (!%p3342_p5), %v3675_v12 }
0x1245   : > { %v2634_v62 = vpop.f32.mrb[52].mxu0 }
0x1246   : > { %v2635_v42 = vadd.f32 %v3332_v41, %v2634_v62  ;;  %v3634_v43 = vpop.f32.mrb[53].mxu0 }
0x1247   : > { %v2637_v44 = vpop.f32.mrb[54].mxu0 }
0x1248   : > { %v2638_v45 = vadd.f32 %v3332_v41, %v2637_v44  ;;  %v3635_v46 = vpop.f32.mrb[55].mxu0  ;;  %v2641_v48 = vmax.f32 %v2635_v42, 0.0 }
0x124a   : > { %v2642_v49 = vmax.f32 %v2638_v45, 0.0 }
0x124c   : > { %v2643_v50 = vpack.c.bf16 %v2642_v49, %v2641_v48 }
0x124e   : > { %3645 = vmatmul.mubr.msk.bf16.vlgmr.msra.gmra.mrb[44].mxu1 %vm2683_vm12, %v2643_v50 }
0x124f   : > { %3682 = vmatpush3.bf16.msra.mxu1 (!%p3342_p5), %v3679_v15 }
0x1250   : > { %3666 = vmatprep.subr.mxu1 (!%p3342_p5), %v2934_v6 }
0x1321   : > { %v2721_v53 = vpop.f32.mrb[44].mxu1 }
0x1322   : > { %v2722_v54 = vadd.f32 %v3336_v51, %v2721_v53  ;;  %v3646_v56 = vpop.f32.mrb[45].mxu1 }
0x1323   : > { %v2724_v57 = vpop.f32.mrb[46].mxu1 }
0x1324   : > { %v2728_v58 = vadd.f32 %v2722_v54, %v2571_v36  ;;  %v2725_v60 = vadd.f32 %v3336_v51, %v2724_v57  ;;  %v3647_v61 = vpop.f32.mrb[47].mxu1 }
0x1326   : > { %v2734_v63 = vmul.f32 %v2733_v55, %v2728_v58  ;;  %v2729_v1 = vadd.f32 %v2725_v60, %v2572_v38  ;;  %2747 = sbr.rel (%p3342_p5) target bundleno = 5880 (0x16f8), region = 124 }
0x1328   : > { %v2740_v2 = vadd.f32 %v2739_v59, %v2734_v63  ;;  %v2735_v5 = vmul.f32 %v2733_v55, %v2729_v1 }
0x132a   : > { %2742 = vst.msk [vmem:[#allocation2] sm:$0xff] %vm1097_vm7, %v2740_v2  ;;  %v2741_v7 = vadd.f32 %v2739_v59, %v2735_v5  ;;  %3656 = vmatprep.mubr.msk.f32.mxu0 (!%p3342_p5), %vm1097_vm7, %v2740_v2 }
0x132c   : > { %2743 = vst.msk [vmem:[#allocation2 + $0x8] sm:$0xff] %vm1097_vm7, %v2741_v7  ;;  %3657 = vmatmul.mubr.msk.f32.vlgmr.msra.gmra.mrb[0].mxu0 (!%p3342_p5), %vm1097_vm7, %v2741_v7 }
0x13ff   : > { %v3658_v17 = vpop.f32.mrb[0].mxu0 }
0x1400   : > { %v2837_v4 = vadd.f32 %v3658_v17, %v3343_v16  ;;  %v2831_v18 = vpop.f32.mrb[1].mxu0 }
0x1401   : > { %v2832_v19 = vadd.f32 %v3343_v16, %v2831_v18 }
0x1402   : > { %v2841_v21 = vmax.f32 %v2837_v4, 0.0 }
0x1403   : > { %v2840_v20 = vmax.f32 %v2832_v19, 0.0 }
0x1405   : > { %3663 = vmatprep.mubr.msk.f32.mxu1 %vm1028_vm6, %v2840_v20 }
0x1406   : > { %3664 = vmatmul.mubr.msk.f32.vlgmr.msra.gmra.mrb[0].mxu1 %vm1028_vm6, %v2841_v21 }
0x1407   : > { %3667 = vmatpush3.msra.mxu1 %v2934_v6 }
0x14d9   : > { %v3665_v23 = vpop.f32.mrb[0].mxu1 }
0x14da   : > { %v2929_v24 = vadd.f32 %v3665_v23, %v3346_v22  ;;  %v2923_v25 = vpop.f32.mrb[1].mxu1 }
0x14db   : > { %v2924_v47 = vadd.f32 %v3346_v22, %v2923_v25 }
0x14dc   : > { %v2933_v28 = vmax.f32 %v2929_v24, 0.0 }
0x14dd   : > { %v2932_v26 = vmax.f32 %v2924_v47, 0.0 }
0x14df   : > { %3668 = vmatprep.mubr.msk.f32.mxu1 %vm1419_vm8, %v2932_v26 }
0x14e0   : > { %3669 = vmatmul.mubr.msk.f32.vlgmr.msra.gmra.mrb[2].mxu1 %vm1419_vm8, %v2933_v28 }
0x15b3   : > { %v3670_v30 = vpop.f32.mrb[2].mxu1 }
0x15b4   : > { %v3014_v31 = vpop.f32.mrb[3].mxu1  ;;  %v3020_v33 = vadd.f32 %v3670_v30, %v3349_v29 }
0x15b5   : > { %v3015_v32 = vadd.f32 %v3349_v29, %v3014_v31 }
0x15b6   : > { %v3027_v35 = vsel %vm3023_vm13, %v3020_v33, -inf }
0x15b7   : > { %v3024_v34 = vsel %vm3023_vm13, %v3015_v32, -inf }
0x15b8   : > { %3025 = vmax.xlane.f32.xlu0 %v3024_v34 }
0x15bc   : > { %3028 = vmax.xlane.f32.xlu0 %v3027_v35 }
0x1645   : > { %v3026_v36 = vpop.xlane.xlu0 %3025 }
0x1646   : > { %v3030_v37 = vsub.f32 %v3015_v32, %v3026_v36 }
0x1648   : > { %v3032_v38 = vmul.f32 1.442695, %v3030_v37 }
0x1649   : > { %v3029_v39 = vpop.xlane.xlu0 %3028 }
0x164a   : > { %3773 = vpow2.f32 %v3032_v38  ;;  %v3031_v40 = vsub.f32 %v3020_v33, %v3029_v39 }
0x164c   : > { %v3034_v0 = vmul.f32 1.442695, %v3031_v40 }
0x164e   : > { %3775 = vpow2.f32 %v3034_v0 }
0x1654   : > { %v3774_v41 = vpop.eup %3773 }
0x1655   : > { %v3036_v62 = vsel %vm3023_vm13, %v3774_v41, 0.0 }
0x1656   : > { %3037 = vadd.xlane.f32.xlu1 %v3036_v62 }
0x1658   : > { %v3776_v42 = vpop.eup %3775 }
0x1659   : > { %v3039_v43 = vsel %vm3023_vm13, %v3776_v42, 0.0 }
0x165a   : > { %3040 = vadd.xlane.f32.xlu1 %v3039_v43 }
0x16e3   : > { %v3038_v44 = vpop.xlane.xlu1 %3037 }
0x16e4   : > { %3777 = vlog2.f32 %v3038_v44 }
0x16e7   : > { %v3041_v45 = vpop.xlane.xlu1 %3040 }
0x16e8   : > { %3779 = vlog2.f32 %v3041_v45 }
0x16ee   : > { %v3778_v46 = vpop.eup %3777 }
0x16ef   : > { %v3043_v48 = vmul.f32 0.6931472, %v3778_v46 }
0x16f1   : > { %v3046_v49 = vsub.f32 %v3030_v37, %v3043_v48 }
0x16f2   : > { %v3780_v50 = vpop.eup %3779 }
0x16f3   : > { %3048 = vst.msk [vmem:[%s4395_s26] sm:$0xff] %vm3023_vm13, %v3046_v49  ;;  %v3045_v27 = vmul.f32 0.6931472, %v3780_v50 }
0x16f5   : > { %v3047_v51 = vsub.f32 %v3031_v40, %v3045_v27 }
0x16f7   : > { %3049 = vst.msk [vmem:[%s4395_s26 + $0x8] sm:$0xff] %vm3023_vm13, %v3047_v51 }
0x16f8 PF: > { %s4396_s19 = sld [smem:[#allocation4_spill]] }
0x16fe   : > { %s34_s5 = sadd.s32 1, %s4396_s19  }
0x16ff   : > { %p31_p6 = scmp.ge.s32.totalorder %s34_s5, 4  }
0x1701   :  { %33 = sbr.rel (!%p31_p6) target bundleno = 19 (0x13), region = 192 }

</bundles_post_ra>
